<compile_context>
chip_gen: v7x
topology: tpu7x:2x2x1
jax: 0.10.0
libtpu: 0.0.40
codegen_flags: <defaults>
</compile_context>

<pallas_src>
import jax
import jax.numpy as jnp
from jax import lax
from jax.experimental import pallas as pl
from jax.experimental.pallas import tpu as pltpu

EPS = 1e-5
NEG_SLOPE = 0.1
VMEM_LIMIT = 48 * 1024 * 1024   # explicit scoped-VMEM budget (safe on v5e/v6e/v7x)


# --------------------------- small helpers ---------------------------

def _round_up(x, m):
    return ((x + m - 1) // m) * m


def _deconv_tile(s, cin, cup, itemsize):
    """Lane tile for the deconv matmul: multiple of 128, sized so the double-buffered
    input+output blocks use ~8 MiB of VMEM; never falls back to the raw spatial extent."""
    bytes_per_lane = 2 * (cin + 4 * cup) * itemsize           # x block + y block, double buffered
    target = (8 << 20) // max(bytes_per_lane, 1)
    target = max(128, min(16384, (target // 128) * 128))
    return min(_round_up(s, 128), target)


def _flat_pad_slab(t_nchw, dtype, c_pad, l_pad):
    """(N, C, H, W) -> (N, c_pad, l_pad): zero ring of 1, channels zero-padded to c_pad,
    flattened spatial zero-padded to l_pad (the conv kernels' I/O layout)."""
    n, c, h, w = t_nchw.shape
    tp = jnp.pad(t_nchw.astype(dtype), ((0, 0), (0, c_pad - c), (1, 1), (1, 1)))
    tp = tp.reshape(n, c_pad, (h + 2) * (w + 2))
    l = (h + 2) * (w + 2)
    if l_pad > l:
        tp = jnp.pad(tp, ((0, 0), (0, 0), (0, l_pad - l)))
    return tp


def _prep_fused_conv_weight(w_hwio, slab_sizes, slab_pads, cout_pad, dtype):
    """HWIO (3, 3, Cin_total, Cout) -> (cout_pad, 9 * sum(slab_pads)) fused matmul weight.
    K ordering = (slab, tap (ky, kx) row-major, channel); padded channels / rows are zero."""
    cout = w_hwio.shape[3]
    pieces = []
    c0 = 0
    for cs, cp in zip(slab_sizes, slab_pads):
        wslab = w_hwio[:, :, c0:c0 + cs, :]                    # (3, 3, cs, cout)
        wslab = jnp.transpose(wslab, (3, 0, 1, 2))             # (cout, 3, 3, cs)
        wslab = jnp.pad(wslab, ((0, cout_pad - cout), (0, 0), (0, 0), (0, cp - cs)))
        pieces.append(wslab.reshape(cout_pad, 9 * cp))
        c0 += cs
    return jnp.concatenate(pieces, axis=1).astype(dtype)


def _pad_vec(v, cout_pad):
    """(Cout,) -> (cout_pad, 1) f32, zero padded (keeps padded output channels exactly zero)."""
    v = jnp.reshape(v, (-1, 1)).astype(jnp.float32)
    return jnp.pad(v, ((0, cout_pad - v.shape[0]), (0, 0)))


def _interior_mask(h, w, l_pad):
    """(1, l_pad) f32 mask: 1 on the h*w valid pixels, 0 on the zero ring and lane tail."""
    m = jnp.zeros((h + 2, w + 2), jnp.float32).at[1:1 + h, 1:1 + w].set(1.0)
    m = m.reshape(1, (h + 2) * (w + 2))
    return jnp.pad(m, ((0, 0), (0, l_pad - m.shape[1])))


# --------------------------- Pallas kernels ---------------------------

def _deconv_matmul_kernel(x_ref, w_ref, b_ref, o_ref):
    # ConvTranspose2d(k=2, s=2) as one matmul per (image, spatial tile):
    #   x: (1, Cin, ts)   w: (4*Cup, Cin), rows ordered (dy, dx, cu)   b: (4*Cup, 1)
    #   o: (1, 4*Cup, ts)  -- lane axis = spatial (128-multiple tile) -> lane-dense stores.
    y = jnp.dot(w_ref[...], x_ref[0], preferred_element_type=jnp.float32) + b_ref[...]
    o_ref[0] = y.astype(o_ref.dtype)


def _make_conv3x3_in_lrelu_kernel(n_slabs, slab_ch, h, w, l_pad):
    """Fused 3x3 conv (zero pad 1, over `n_slabs` channel slabs) + bias + InstanceNorm(affine)
    + LeakyReLU, one image per grid step.

    Activations are in "flat padded" layout: (C, Lpad), Lpad = round_up((h+2)*(w+2), 128),
    row stride Wp = w+2, a zero ring of one pixel, spatial on the lane axis.  All 9 taps of
    every slab are staged as exact lane rolls of the bf16 slab in one K-major VMEM scratch and
    contracted with a SINGLE MXU matmul (f32 accumulation).  The output is written in the same
    flat padded layout (zero ring / lane tail kept exactly zero) so it feeds the next conv
    without any relayout or re-pad pass in HBM.
    """
    wp = w + 2
    offs = [(ky - 1) * wp + (kx - 1) for ky in range(3) for kx in range(3)]
    inv_n = 1.0 / float(h * w)

    def kernel(*refs):
        x_refs = refs[:n_slabs]
        w_ref, mask_ref, b_ref, g_ref, beta_ref, o_ref, k_ref = refs[n_slabs:]

        # ---- stage the fused K operand: (9 * sum(C_s), Lpad), stays in the MXU dtype ----
        row = 0
        for s in range(n_slabs):
            x = x_refs[s][0]                                   # (C_s, Lpad) bf16, no f32 round trip
            for off in offs:
                sft = off % l_pad
                if sft == 0:
                    rolled = x
                else:
                    # exact circular lane roll: rolled[:, p] = x[:, (p + off) % Lpad];
                    # for interior output pixels p + off never leaves [0, L), so this equals
                    # the zero-padded shift; wrapped lanes only hit masked ring/tail positions.
                    rolled = jnp.concatenate([x[:, sft:], x[:, :sft]], axis=1)
                k_ref[pl.ds(row, slab_ch[s]), :] = rolled      # aligned sublane offset (C_s % 16 == 0)
                row += slab_ch[s]

        # ---- one fused matmul over (slab, tap, channel) ----
        acc = jnp.dot(w_ref[...], k_ref[...], preferred_element_type=jnp.float32)  # (Cout_p, Lpad)
        acc = acc + b_ref[...]                                 # (Cout_p, 1) broadcast over lanes

        # InstanceNorm over the h*w valid pixels: single pass (sum & sum-of-squares).
        mask = mask_ref[...]                                   # (1, Lpad) of {0, 1}
        am = acc * mask
        s1 = jnp.sum(am, axis=1, keepdims=True)
        s2 = jnp.sum(am * am, axis=1, keepdims=True)
        mean = s1 * inv_n
        var = jnp.maximum(s2 * inv_n - mean * mean, 0.0)       # clamp f32 cancellation
        y = (acc - mean) * lax.rsqrt(var + EPS)
        y = y * g_ref[...] + beta_ref[...]
        y = jnp.maximum(y, NEG_SLOPE * y)                      # LeakyReLU(0.1) = one VALU max
        o_ref[0] = (y * mask).astype(o_ref.dtype)              # keep zero ring / lane tail exact

    return kernel


# --------------------------- op wrappers (pallas_call glue) ---------------------------

def deconv2x2_stride2(x_nchw, wt, bt, compute_dtype):
    """ConvTranspose2d(kernel=2, stride=2). wt: (Cin, Cup, 2, 2) torch layout, bt: (Cup,).
    Returns the upsampled feature map in NCHW, (N, Cup, 2H, 2W)."""
    n, cin, h, w = x_nchw.shape
    cup = wt.shape[1]
    s = h * w
    itemsize = jnp.dtype(compute_dtype).itemsize
    ts = _deconv_tile(s, cin, cup, itemsize)
    s_pad = _round_up(s, ts)

    # rows ordered (dy, dx, cu) so the per-pixel 2x2 output patch comes out of one matmul
    wmat = jnp.transpose(wt, (2, 3, 1, 0)).reshape(4 * cup, cin).astype(compute_dtype)
    bmat = jnp.tile(bt, 4).reshape(4 * cup, 1).astype(jnp.float32)
    xf = x_nchw.reshape(n, cin, s).astype(compute_dtype)
    if s_pad > s:
        xf = jnp.pad(xf, ((0, 0), (0, 0), (0, s_pad - s)))

    u = pl.pallas_call(
        _deconv_matmul_kernel,
        out_shape=jax.ShapeDtypeStruct((n, 4 * cup, s_pad), compute_dtype),
        grid=(n, s_pad // ts),
        in_specs=[
            pl.BlockSpec((1, cin, ts), lambda i, j: (i, 0, j)),
            pl.BlockSpec((4 * cup, cin), lambda i, j: (0, 0)),
            pl.BlockSpec((4 * cup, 1), lambda i, j: (0, 0)),
        ],
        out_specs=pl.BlockSpec((1, 4 * cup, ts), lambda i, j: (i, 0, j)),
        compiler_params=pltpu.CompilerParams(
            dimension_semantics=("parallel", "parallel"),
            vmem_limit_bytes=VMEM_LIMIT),
    )(xf, wmat, bmat)

    # 2x2 interleave (dy, dx) into the spatial dims: (n, dy, dx, cu, h, w) -> (n, cu, 2h+dy, 2w+dx).
    # TODO(synk): fold this interleave (and the downstream zero-ring pad) into the kernels to
    # save the remaining small HBM passes over the Cup-channel upsampled tensor.
    u = u[:, :, :s].reshape(n, 2, 2, cup, h, w)
    x0 = jnp.transpose(u, (0, 3, 4, 1, 5, 2)).reshape(n, cup, 2 * h, 2 * w)
    return x0


def conv3x3_in_lrelu(slab_acts, w_fused, mask, b, g, beta, h, w, l_pad, cout_pad, out_dtype):
    """One fused Convolution block (3x3 conv + bias + InstanceNorm + LeakyReLU).

    slab_acts: list of (N, C_s_pad, l_pad) bf16 activations in flat zero-ring-padded layout.
    w_fused:   (cout_pad, 9 * sum(C_s_pad)) fused matmul weight (K = slab/tap/channel-major).
    Returns (N, cout_pad, l_pad) in the same flat padded layout (zero ring / tail preserved,
    padded output channels exactly zero)."""
    n_slabs = len(slab_acts)
    n = slab_acts[0].shape[0]
    slab_ch = tuple(a.shape[1] for a in slab_acts)
    k_total = w_fused.shape[1]
    kernel = _make_conv3x3_in_lrelu_kernel(n_slabs, slab_ch, h, w, l_pad)

    bvec, gvec, betavec = _pad_vec(b, cout_pad), _pad_vec(g, cout_pad), _pad_vec(beta, cout_pad)
    in_specs = (
        [pl.BlockSpec((1, c, l_pad), lambda i: (i, 0, 0)) for c in slab_ch]
        + [pl.BlockSpec((cout_pad, k_total), lambda i: (0, 0)),
           pl.BlockSpec((1, l_pad), lambda i: (0, 0)),
           pl.BlockSpec((cout_pad, 1), lambda i: (0, 0)),
           pl.BlockSpec((cout_pad, 1), lambda i: (0, 0)),
           pl.BlockSpec((cout_pad, 1), lambda i: (0, 0))]
    )
    # TODO(synk): for production-size maps on v7x (64 MiB VMEM), tile spatially with an
    # 'arbitrary' grid axis + two-pass InstanceNorm, and add a second parallel axis for 2 TCs.
    return pl.pallas_call(
        kernel,
        out_shape=jax.ShapeDtypeStruct((n, cout_pad, l_pad), out_dtype),
        grid=(n,),
        in_specs=in_specs,
        out_specs=pl.BlockSpec((1, cout_pad, l_pad), lambda i: (i, 0, 0)),
        scratch_shapes=[pltpu.VMEM((k_total, l_pad), w_fused.dtype)],
        compiler_params=pltpu.CompilerParams(
            dimension_semantics=("parallel",),
            vmem_limit_bytes=VMEM_LIMIT),
    )(*slab_acts, w_fused, mask, bvec, gvec, betavec)


def upcat_forward(x_nchw, xe_nchw, params, compute_dtype=jnp.bfloat16):
    """UpCat.forward: upsample(x) -> (replicate-pad) -> cat([x_e, x_0], C) -> TwoConv.
    Inputs / outputs are PyTorch-style NCHW float32."""
    x_nchw = x_nchw.astype(jnp.float32)
    x0 = deconv2x2_stride2(x_nchw, params["up_w"], params["up_b"], compute_dtype)

    cgrain = 16 if jnp.dtype(compute_dtype).itemsize == 2 else 8
    cout = params["c0_b"].shape[0]
    cout_pad = _round_up(cout, cgrain)

    if xe_nchw is not None:
        xe = xe_nchw.astype(jnp.float32)
        # is_pad=True: replicate-pad the trailing edge of any mismatching spatial dim of x_0.
        ph = xe.shape[2] - x0.shape[2]
        pw = xe.shape[3] - x0.shape[3]
        if ph > 0 or pw > 0:
            x0 = jnp.pad(x0, ((0, 0), (0, 0), (0, max(ph, 0)), (0, max(pw, 0))), mode="edge")
        h2, w2 = x0.shape[2], x0.shape[3]
        L = (h2 + 2) * (w2 + 2)
        l_pad = _round_up(L, 128)
        ce, cup = xe.shape[1], x0.shape[1]
        ce_pad, cup_pad = _round_up(ce, cgrain), _round_up(cup, cgrain)
        # torch.cat([x_e, x_0], dim=1) is fused into conv_0: two slabs + Cin-split fused weights.
        acts0 = [_flat_pad_slab(xe, compute_dtype, ce_pad, l_pad),
                 _flat_pad_slab(x0, compute_dtype, cup_pad, l_pad)]
        w0 = _prep_fused_conv_weight(params["c0_w"], (ce, cup), (ce_pad, cup_pad),
                                     cout_pad, compute_dtype)
    else:
        h2, w2 = x0.shape[2], x0.shape[3]
        L = (h2 + 2) * (w2 + 2)
        l_pad = _round_up(L, 128)
        cup = x0.shape[1]
        cup_pad = _round_up(cup, cgrain)
        acts0 = [_flat_pad_slab(x0, compute_dtype, cup_pad, l_pad)]
        w0 = _prep_fused_conv_weight(params["c0_w"], (cup,), (cup_pad,), cout_pad, compute_dtype)

    mask = _interior_mask(h2, w2, l_pad)

    z0 = conv3x3_in_lrelu(acts0, w0, mask,
                          params["c0_b"], params["c0_g"], params["c0_beta"],
                          h2, w2, l_pad, cout_pad, out_dtype=compute_dtype)
    w1 = _prep_fused_conv_weight(params["c1_w"], (cout,), (cout_pad,), cout_pad, compute_dtype)
    z1 = conv3x3_in_lrelu([z0], w1, mask,
                          params["c1_b"], params["c1_g"], params["c1_beta"],
                          h2, w2, l_pad, cout_pad, out_dtype=jnp.float32)

    n = x_nchw.shape[0]
    out = z1[:, :cout, :L].reshape(n, cout, h2 + 2, w2 + 2)[:, :, 1:1 + h2, 1:1 + w2]
    return out
    # TODO(synk): upsample modes 'pixelshuffle' / 'nontrainable' (interp) are config branches of
    # UpCat not exercised by the default 'deconv' path and are not implemented here.


# --------------------------- pure-JAX reference (for validation) ---------------------------

def _ref_in_lrelu(z, g, b):
    mean = z.mean(axis=(1, 2), keepdims=True)
    var = ((z - mean) ** 2).mean(axis=(1, 2), keepdims=True)
    z = (z - mean) * lax.rsqrt(var + EPS) * g + b
    return jnp.where(z >= 0, z, NEG_SLOPE * z)


def ref_forward(x_nchw, xe_nchw, p):
    x = jnp.transpose(x_nchw, (0, 2, 3, 1)).astype(jnp.float32)
    y = jnp.einsum("nhwc,coyx->nhywxo", x, p["up_w"])
    N, H, _, W, _, Cup = y.shape
    x0 = y.reshape(N, 2 * H, 2 * W, Cup) + p["up_b"]
    xe = jnp.transpose(xe_nchw, (0, 2, 3, 1)).astype(jnp.float32)
    z = jnp.concatenate([xe, x0], axis=-1)
    for tag in ("c0", "c1"):
        z = lax.conv_general_dilated(z, p[tag + "_w"], (1, 1), "SAME",
                                     dimension_numbers=("NHWC", "HWIO", "NHWC")) + p[tag + "_b"]
        z = _ref_in_lrelu(z, p[tag + "_g"], p[tag + "_beta"])
    return jnp.transpose(z, (0, 3, 1, 2))


# --------------------------- main ---------------------------

if __name__ == "__main__":
    key = jax.random.PRNGKey(0)
    N, in_chns, cat_chns, out_chns = 2, 8, 4, 8
    H = W = 8
    up_chns = in_chns // 2  # halves=True, upsample='deconv'

    ks = jax.random.split(key, 12)
    x = jax.random.normal(ks[0], (N, in_chns, H, W), jnp.float32)             # NCHW
    x_e = jax.random.normal(ks[1], (N, cat_chns, 2 * H, 2 * W), jnp.float32)  # NCHW

    params = {
        # ConvTranspose2d(in_chns, up_chns, k=2, s=2): weight (Cin, Cup, 2, 2), bias (Cup,)
        "up_w": 0.2 * jax.random.normal(ks[2], (in_chns, up_chns, 2, 2), jnp.float32),
        "up_b": 0.1 * jax.random.normal(ks[3], (up_chns,), jnp.float32),
        # conv_0: (cat_chns + up_chns) -> out_chns, weights stored HWIO
        "c0_w": 0.2 * jax.random.normal(ks[4], (3, 3, cat_chns + up_chns, out_chns), jnp.float32),
        "c0_b": 0.1 * jax.random.normal(ks[5], (out_chns,), jnp.float32),
        "c0_g": 1.0 + 0.1 * jax.random.normal(ks[6], (out_chns,), jnp.float32),
        "c0_beta": 0.1 * jax.random.normal(ks[7], (out_chns,), jnp.float32),
        # conv_1: out_chns -> out_chns
        "c1_w": 0.2 * jax.random.normal(ks[8], (3, 3, out_chns, out_chns), jnp.float32),
        "c1_b": 0.1 * jax.random.normal(ks[9], (out_chns,), jnp.float32),
        "c1_g": 1.0 + 0.1 * jax.random.normal(ks[10], (out_chns,), jnp.float32),
        "c1_beta": 0.1 * jax.random.normal(ks[11], (out_chns,), jnp.float32),
    }

    fwd = jax.jit(upcat_forward)
    out = jax.block_until_ready(fwd(x, x_e, params))
    assert out.shape == (N, out_chns, 2 * H, 2 * W), out.shape

    ref = jax.block_until_ready(ref_forward(x, x_e, params))
    # MXU operands are bf16 (activations + weights), so compare at bf16-level tolerance;
    # any structural bug (wrong tap offset / weight split / layout) would give O(1) errors.
    if not jnp.allclose(out, ref, atol=5e-2, rtol=5e-2):
        err = float(jnp.max(jnp.abs(out - ref)))
        raise AssertionError(f"Pallas UpCat output does not match JAX reference (max abs err {err:.4f})")

    print("KERNEL_OK")
</pallas_src>

<mosaic_0001>
module attributes {stable_mosaic.version = 11 : i64} {
  func.func @_deconv_matmul_kernel(%arg0: i32, %arg1: i32, %arg2: memref<1x8x128xbf16, #tpu.memory_space<vmem>>, %arg3: memref<16x8xbf16, #tpu.memory_space<vmem>>, %arg4: memref<16x1xf32, #tpu.memory_space<vmem>>, %arg5: memref<1x16x128xbf16, #tpu.memory_space<vmem>>) attributes {dimension_semantics = [#tpu.dimension_semantics<parallel>, #tpu.dimension_semantics<parallel>], iteration_bounds = array<i64: 2, 1>, scalar_prefetch = 0 : i64, scratch_operands = 0 : i64, tpu.core_type = #tpu.core_type<tc>, window_params = [{transform_indices = @transform_0, window_bounds = array<i64: 1, 8, 128>}, {pipeline_mode = #tpu.pipeline_mode<synchronous>, transform_indices = @transform_1, window_bounds = array<i64: 16, 8>}, {pipeline_mode = #tpu.pipeline_mode<synchronous>, transform_indices = @transform_2, window_bounds = array<i64: 16, 1>}, {transform_indices = @transform_3, window_bounds = array<i64: 1, 16, 128>}]} {
    %c0 = arith.constant 0 : index
    %c0_0 = arith.constant 0 : index
    %0 = vector.load %arg3[%c0, %c0_0] : memref<16x8xbf16, #tpu.memory_space<vmem>>, vector<16x8xbf16>
    %c0_1 = arith.constant 0 : index
    %c0_2 = arith.constant 0 : index
    %c0_3 = arith.constant 0 : index
    %1 = vector.load %arg2[%c0_1, %c0_2, %c0_3] : memref<1x8x128xbf16, #tpu.memory_space<vmem>>, vector<1x8x128xbf16>
    %2 = vector.shape_cast %1 : vector<1x8x128xbf16> to vector<8x128xbf16>
    %cst = arith.constant dense<0.000000e+00> : vector<16x128xf32>
    %3 = tpu.matmul %0, %2, %cst {dimension_numbers = #tpu.dot_dimension_numbers<[1], [0], [0], [1], [0, 0, 1, 1], [], []>} : vector<16x8xbf16>, vector<8x128xbf16>, vector<16x128xf32> -> vector<16x128xf32>
    %c0_4 = arith.constant 0 : index
    %c0_5 = arith.constant 0 : index
    %4 = vector.load %arg4[%c0_4, %c0_5] : memref<16x1xf32, #tpu.memory_space<vmem>>, vector<16x1xf32>
    %5 = vector.broadcast %4 : vector<16x1xf32> to vector<16x128xf32>
    %6 = arith.addf %3, %5 : vector<16x128xf32>
    %7 = arith.truncf %6 : vector<16x128xf32> to vector<16x128xbf16>
    %c0_6 = arith.constant 0 : index
    %c0_7 = arith.constant 0 : index
    %c0_8 = arith.constant 0 : index
    %8 = vector.load %arg5[%c0_6, %c0_7, %c0_8] : memref<1x16x128xbf16, #tpu.memory_space<vmem>>, vector<1x16x128xbf16>
    %9 = vector.shape_cast %8 : vector<1x16x128xbf16> to vector<16x128xbf16>
    %10 = vector.shape_cast %7 : vector<16x128xbf16> to vector<1x16x128xbf16>
    tpu.vector_store %arg5[%c0_6, %c0_7, %c0_8], %10 {strides = array<i32>} : memref<1x16x128xbf16, #tpu.memory_space<vmem>>, vector<1x16x128xbf16>,
    return
  }
  func.func @transform_0(%arg0: i32, %arg1: i32) -> (i32, i32, i32) {
    %c0_i32 = arith.constant 0 : i32
    %c0_i32_0 = arith.constant 0 : i32
    return %arg0, %c0_i32, %arg1 : i32, i32, i32
  }
  func.func @transform_1(%arg0: i32, %arg1: i32) -> (i32, i32) {
    %c0_i32 = arith.constant 0 : i32
    %c0_i32_0 = arith.constant 0 : i32
    %c0_i32_1 = arith.constant 0 : i32
    return %c0_i32, %c0_i32_0 : i32, i32
  }
  func.func @transform_2(%arg0: i32, %arg1: i32) -> (i32, i32) {
    %c0_i32 = arith.constant 0 : i32
    %c0_i32_0 = arith.constant 0 : i32
    %c0_i32_1 = arith.constant 0 : i32
    return %c0_i32, %c0_i32_0 : i32, i32
  }
  func.func @transform_3(%arg0: i32, %arg1: i32) -> (i32, i32, i32) {
    %c0_i32 = arith.constant 0 : i32
    %c0_i32_0 = arith.constant 0 : i32
    return %arg0, %c0_i32, %arg1 : i32, i32, i32
  }
}

module attributes {stable_mosaic.version = 11 : i64} {
  func.func @kernel(%arg0: i32, %arg1: memref<1x16x384xbf16, #tpu.memory_space<vmem>>, %arg2: memref<16x144xbf16, #tpu.memory_space<vmem>>, %arg3: memref<1x384xf32, #tpu.memory_space<vmem>>, %arg4: memref<16x1xf32, #tpu.memory_space<vmem>>, %arg5: memref<16x1xf32, #tpu.memory_space<vmem>>, %arg6: memref<16x1xf32, #tpu.memory_space<vmem>>, %arg7: memref<1x16x384xf32, #tpu.memory_space<vmem>>, %arg8: memref<144x384xbf16, #tpu.memory_space<vmem>>) attributes {dimension_semantics = [#tpu.dimension_semantics<parallel>], iteration_bounds = array<i64: 2>, scalar_prefetch = 0 : i64, scratch_operands = 1 : i64, tpu.core_type = #tpu.core_type<tc>, window_params = [{transform_indices = @transform_0, window_bounds = array<i64: 1, 16, 384>}, {pipeline_mode = #tpu.pipeline_mode<synchronous>, transform_indices = @transform_1, window_bounds = array<i64: 16, 144>}, {pipeline_mode = #tpu.pipeline_mode<synchronous>, transform_indices = @transform_2, window_bounds = array<i64: 1, 384>}, {pipeline_mode = #tpu.pipeline_mode<synchronous>, transform_indices = @transform_3, window_bounds = array<i64: 16, 1>}, {pipeline_mode = #tpu.pipeline_mode<synchronous>, transform_indices = @transform_4, window_bounds = array<i64: 16, 1>}, {pipeline_mode = #tpu.pipeline_mode<synchronous>, transform_indices = @transform_5, window_bounds = array<i64: 16, 1>}, {transform_indices = @transform_6, window_bounds = array<i64: 1, 16, 384>}]} {
    %c0 = arith.constant 0 : index
    %c0_0 = arith.constant 0 : index
    %c0_1 = arith.constant 0 : index
    %0 = vector.load %arg1[%c0, %c0_0, %c0_1] : memref<1x16x384xbf16, #tpu.memory_space<vmem>>, vector<1x16x384xbf16>
    %1 = vector.shape_cast %0 : vector<1x16x384xbf16> to vector<16x384xbf16>
    %2 = vector.extract_strided_slice %1 {offsets = [0, 365], sizes = [16, 19], strides = [1, 1]} : vector<16x384xbf16> to vector<16x19xbf16>
    %3 = vector.extract_strided_slice %1 {offsets = [0, 0], sizes = [16, 365], strides = [1, 1]} : vector<16x384xbf16> to vector<16x365xbf16>
    %4 = tpu.concatenate %2, %3 in 1 : vector<16x19xbf16>, vector<16x365xbf16> -> vector<16x384xbf16>
    %c0_2 = arith.constant 0 : index
    %c0_3 = arith.constant 0 : index
    %5 = vector.load %arg8[%c0_2, %c0_3] : memref<144x384xbf16, #tpu.memory_space<vmem>>, vector<16x384xbf16>
    tpu.vector_store %arg8[%c0_2, %c0_3], %4 {strides = array<i32>} : memref<144x384xbf16, #tpu.memory_space<vmem>>, vector<16x384xbf16>,
    %6 = vector.extract_strided_slice %1 {offsets = [0, 366], sizes = [16, 18], strides = [1, 1]} : vector<16x384xbf16> to vector<16x18xbf16>
    %7 = vector.extract_strided_slice %1 {offsets = [0, 0], sizes = [16, 366], strides = [1, 1]} : vector<16x384xbf16> to vector<16x366xbf16>
    %8 = tpu.concatenate %6, %7 in 1 : vector<16x18xbf16>, vector<16x366xbf16> -> vector<16x384xbf16>
    %c16 = arith.constant 16 : index
    %c0_4 = arith.constant 0 : index
    %9 = vector.load %arg8[%c16, %c0_4] : memref<144x384xbf16, #tpu.memory_space<vmem>>, vector<16x384xbf16>
    tpu.vector_store %arg8[%c16, %c0_4], %8 {strides = array<i32>} : memref<144x384xbf16, #tpu.memory_space<vmem>>, vector<16x384xbf16>,
    %10 = vector.extract_strided_slice %1 {offsets = [0, 367], sizes = [16, 17], strides = [1, 1]} : vector<16x384xbf16> to vector<16x17xbf16>
    %11 = vector.extract_strided_slice %1 {offsets = [0, 0], sizes = [16, 367], strides = [1, 1]} : vector<16x384xbf16> to vector<16x367xbf16>
    %12 = tpu.concatenate %10, %11 in 1 : vector<16x17xbf16>, vector<16x367xbf16> -> vector<16x384xbf16>
    %c32 = arith.constant 32 : index
    %c0_5 = arith.constant 0 : index
    %13 = vector.load %arg8[%c32, %c0_5] : memref<144x384xbf16, #tpu.memory_space<vmem>>, vector<16x384xbf16>
    tpu.vector_store %arg8[%c32, %c0_5], %12 {strides = array<i32>} : memref<144x384xbf16, #tpu.memory_space<vmem>>, vector<16x384xbf16>,
    %14 = vector.extract_strided_slice %1 {offsets = [0, 383], sizes = [16, 1], strides = [1, 1]} : vector<16x384xbf16> to vector<16x1xbf16>
    %15 = vector.extract_strided_slice %1 {offsets = [0, 0], sizes = [16, 383], strides = [1, 1]} : vector<16x384xbf16> to vector<16x383xbf16>
    %16 = tpu.concatenate %14, %15 in 1 : vector<16x1xbf16>, vector<16x383xbf16> -> vector<16x384xbf16>
    %c48 = arith.constant 48 : index
    %c0_6 = arith.constant 0 : index
    %17 = vector.load %arg8[%c48, %c0_6] : memref<144x384xbf16, #tpu.memory_space<vmem>>, vector<16x384xbf16>
    tpu.vector_store %arg8[%c48, %c0_6], %16 {strides = array<i32>} : memref<144x384xbf16, #tpu.memory_space<vmem>>, vector<16x384xbf16>,
    %c64 = arith.constant 64 : index
    %c0_7 = arith.constant 0 : index
    %18 = vector.load %arg8[%c64, %c0_7] : memref<144x384xbf16, #tpu.memory_space<vmem>>, vector<16x384xbf16>
    tpu.vector_store %arg8[%c64, %c0_7], %1 {strides = array<i32>} : memref<144x384xbf16, #tpu.memory_space<vmem>>, vector<16x384xbf16>,
    %19 = vector.extract_strided_slice %1 {offsets = [0, 1], sizes = [16, 383], strides = [1, 1]} : vector<16x384xbf16> to vector<16x383xbf16>
    %20 = vector.extract_strided_slice %1 {offsets = [0, 0], sizes = [16, 1], strides = [1, 1]} : vector<16x384xbf16> to vector<16x1xbf16>
    %21 = tpu.concatenate %19, %20 in 1 : vector<16x383xbf16>, vector<16x1xbf16> -> vector<16x384xbf16>
    %c80 = arith.constant 80 : index
    %c0_8 = arith.constant 0 : index
    %22 = vector.load %arg8[%c80, %c0_8] : memref<144x384xbf16, #tpu.memory_space<vmem>>, vector<16x384xbf16>
    tpu.vector_store %arg8[%c80, %c0_8], %21 {strides = array<i32>} : memref<144x384xbf16, #tpu.memory_space<vmem>>, vector<16x384xbf16>,
    %23 = vector.extract_strided_slice %1 {offsets = [0, 17], sizes = [16, 367], strides = [1, 1]} : vector<16x384xbf16> to vector<16x367xbf16>
    %24 = vector.extract_strided_slice %1 {offsets = [0, 0], sizes = [16, 17], strides = [1, 1]} : vector<16x384xbf16> to vector<16x17xbf16>
    %25 = tpu.concatenate %23, %24 in 1 : vector<16x367xbf16>, vector<16x17xbf16> -> vector<16x384xbf16>
    %c96 = arith.constant 96 : index
    %c0_9 = arith.constant 0 : index
    %26 = vector.load %arg8[%c96, %c0_9] : memref<144x384xbf16, #tpu.memory_space<vmem>>, vector<16x384xbf16>
    tpu.vector_store %arg8[%c96, %c0_9], %25 {strides = array<i32>} : memref<144x384xbf16, #tpu.memory_space<vmem>>, vector<16x384xbf16>,
    %27 = vector.extract_strided_slice %1 {offsets = [0, 18], sizes = [16, 366], strides = [1, 1]} : vector<16x384xbf16> to vector<16x366xbf16>
    %28 = vector.extract_strided_slice %1 {offsets = [0, 0], sizes = [16, 18], strides = [1, 1]} : vector<16x384xbf16> to vector<16x18xbf16>
    %29 = tpu.concatenate %27, %28 in 1 : vector<16x366xbf16>, vector<16x18xbf16> -> vector<16x384xbf16>
    %c112 = arith.constant 112 : index
    %c0_10 = arith.constant 0 : index
    %30 = vector.load %arg8[%c112, %c0_10] : memref<144x384xbf16, #tpu.memory_space<vmem>>, vector<16x384xbf16>
    tpu.vector_store %arg8[%c112, %c0_10], %29 {strides = array<i32>} : memref<144x384xbf16, #tpu.memory_space<vmem>>, vector<16x384xbf16>,
    %31 = vector.extract_strided_slice %1 {offsets = [0, 19], sizes = [16, 365], strides = [1, 1]} : vector<16x384xbf16> to vector<16x365xbf16>
    %32 = vector.extract_strided_slice %1 {offsets = [0, 0], sizes = [16, 19], strides = [1, 1]} : vector<16x384xbf16> to vector<16x19xbf16>
    %33 = tpu.concatenate %31, %32 in 1 : vector<16x365xbf16>, vector<16x19xbf16> -> vector<16x384xbf16>
    %c128 = arith.constant 128 : index
    %c0_11 = arith.constant 0 : index
    %34 = vector.load %arg8[%c128, %c0_11] : memref<144x384xbf16, #tpu.memory_space<vmem>>, vector<16x384xbf16>
    tpu.vector_store %arg8[%c128, %c0_11], %33 {strides = array<i32>} : memref<144x384xbf16, #tpu.memory_space<vmem>>, vector<16x384xbf16>,
    %c0_12 = arith.constant 0 : index
    %c0_13 = arith.constant 0 : index
    %35 = vector.load %arg2[%c0_12, %c0_13] : memref<16x144xbf16, #tpu.memory_space<vmem>>, vector<16x144xbf16>
    %c0_14 = arith.constant 0 : index
    %c0_15 = arith.constant 0 : index
    %36 = vector.load %arg8[%c0_14, %c0_15] : memref<144x384xbf16, #tpu.memory_space<vmem>>, vector<144x384xbf16>
    %cst = arith.constant dense<0.000000e+00> : vector<16x384xf32>
    %37 = tpu.matmul %35, %36, %cst {dimension_numbers = #tpu.dot_dimension_numbers<[1], [0], [0], [1], [0, 0, 1, 1], [], []>} : vector<16x144xbf16>, vector<144x384xbf16>, vector<16x384xf32> -> vector<16x384xf32>
    %c0_16 = arith.constant 0 : index
    %c0_17 = arith.constant 0 : index
    %38 = vector.load %arg4[%c0_16, %c0_17] : memref<16x1xf32, #tpu.memory_space<vmem>>, vector<16x1xf32>
    %39 = vector.broadcast %38 : vector<16x1xf32> to vector<16x384xf32>
    %40 = arith.addf %37, %39 : vector<16x384xf32>
    %c0_18 = arith.constant 0 : index
    %c0_19 = arith.constant 0 : index
    %41 = vector.load %arg3[%c0_18, %c0_19] : memref<1x384xf32, #tpu.memory_space<vmem>>, vector<1x384xf32>
    %42 = vector.broadcast %41 : vector<1x384xf32> to vector<16x384xf32>
    %43 = arith.mulf %40, %42 : vector<16x384xf32>
    %cst_20 = arith.constant dense<0.000000e+00> : vector<16xf32>
    %44 = vector.multi_reduction <add>, %43, %cst_20 [1] : vector<16x384xf32> to vector<16xf32>
    %45 = vector.shape_cast %44 : vector<16xf32> to vector<16x1xf32>
    %46 = arith.mulf %43, %43 : vector<16x384xf32>
    %cst_21 = arith.constant dense<0.000000e+00> : vector<16xf32>
    %47 = vector.multi_reduction <add>, %46, %cst_21 [1] : vector<16x384xf32> to vector<16xf32>
    %48 = vector.shape_cast %47 : vector<16xf32> to vector<16x1xf32>
    %cst_22 = arith.constant 3.906250e-03 : f32
    %49 = vector.broadcast %cst_22 : f32 to vector<16x1xf32>
    %50 = arith.mulf %45, %49 : vector<16x1xf32>
    %cst_23 = arith.constant 3.906250e-03 : f32
    %51 = vector.broadcast %cst_23 : f32 to vector<16x1xf32>
    %52 = arith.mulf %48, %51 : vector<16x1xf32>
    %53 = arith.mulf %50, %50 : vector<16x1xf32>
    %54 = arith.subf %52, %53 : vector<16x1xf32>
    %cst_24 = arith.constant 0.000000e+00 : f32
    %55 = vector.broadcast %cst_24 : f32 to vector<16x1xf32>
    %56 = arith.maximumf %54, %55 : vector<16x1xf32>
    %57 = vector.broadcast %50 : vector<16x1xf32> to vector<16x384xf32>
    %58 = arith.subf %40, %57 : vector<16x384xf32>
    %cst_25 = arith.constant 9.99999974E-6 : f32
    %59 = vector.broadcast %cst_25 : f32 to vector<16x1xf32>
    %60 = arith.addf %56, %59 : vector<16x1xf32>
    %61 = math.rsqrt %60 : vector<16x1xf32>
    %62 = vector.broadcast %61 : vector<16x1xf32> to vector<16x384xf32>
    %63 = arith.mulf %58, %62 : vector<16x384xf32>
    %c0_26 = arith.constant 0 : index
    %c0_27 = arith.constant 0 : index
    %64 = vector.load %arg5[%c0_26, %c0_27] : memref<16x1xf32, #tpu.memory_space<vmem>>, vector<16x1xf32>
    %65 = vector.broadcast %64 : vector<16x1xf32> to vector<16x384xf32>
    %66 = arith.mulf %63, %65 : vector<16x384xf32>
    %c0_28 = arith.constant 0 : index
    %c0_29 = arith.constant 0 : index
    %67 = vector.load %arg6[%c0_28, %c0_29] : memref<16x1xf32, #tpu.memory_space<vmem>>, vector<16x1xf32>
    %68 = vector.broadcast %67 : vector<16x1xf32> to vector<16x384xf32>
    %69 = arith.addf %66, %68 : vector<16x384xf32>
    %cst_30 = arith.constant 1.000000e-01 : f32
    %70 = vector.broadcast %cst_30 : f32 to vector<16x384xf32>
    %71 = arith.mulf %70, %69 : vector<16x384xf32>
    %72 = arith.maximumf %69, %71 : vector<16x384xf32>
    %73 = vector.broadcast %41 : vector<1x384xf32> to vector<16x384xf32>
    %74 = arith.mulf %72, %73 : vector<16x384xf32>
    %c0_31 = arith.constant 0 : index
    %c0_32 = arith.constant 0 : index
    %c0_33 = arith.constant 0 : index
    %75 = vector.load %arg7[%c0_31, %c0_32, %c0_33] : memref<1x16x384xf32, #tpu.memory_space<vmem>>, vector<1x16x384xf32>
    %76 = vector.shape_cast %75 : vector<1x16x384xf32> to vector<16x384xf32>
    %77 = vector.shape_cast %74 : vector<16x384xf32> to vector<1x16x384xf32>
    tpu.vector_store %arg7[%c0_31, %c0_32, %c0_33], %77 {strides = array<i32>} : memref<1x16x384xf32, #tpu.memory_space<vmem>>, vector<1x16x384xf32>,
    return
  }
  func.func @transform_0(%arg0: i32) -> (i32, i32, i32) {
    %c0_i32 = arith.constant 0 : i32
    %c0_i32_0 = arith.constant 0 : i32
    %c0_i32_1 = arith.constant 0 : i32
    return %arg0, %c0_i32, %c0_i32_0 : i32, i32, i32
  }
  func.func @transform_1(%arg0: i32) -> (i32, i32) {
    %c0_i32 = arith.constant 0 : i32
    %c0_i32_0 = arith.constant 0 : i32
    %c0_i32_1 = arith.constant 0 : i32
    return %c0_i32, %c0_i32_0 : i32, i32
  }
  func.func @transform_2(%arg0: i32) -> (i32, i32) {
    %c0_i32 = arith.constant 0 : i32
    %c0_i32_0 = arith.constant 0 : i32
    %c0_i32_1 = arith.constant 0 : i32
    return %c0_i32, %c0_i32_0 : i32, i32
  }
  func.func @transform_3(%arg0: i32) -> (i32, i32) {
    %c0_i32 = arith.constant 0 : i32
    %c0_i32_0 = arith.constant 0 : i32
    %c0_i32_1 = arith.constant 0 : i32
    return %c0_i32, %c0_i32_0 : i32, i32
  }
  func.func @transform_4(%arg0: i32) -> (i32, i32) {
    %c0_i32 = arith.constant 0 : i32
    %c0_i32_0 = arith.constant 0 : i32
    %c0_i32_1 = arith.constant 0 : i32
    return %c0_i32, %c0_i32_0 : i32, i32
  }
  func.func @transform_5(%arg0: i32) -> (i32, i32) {
    %c0_i32 = arith.constant 0 : i32
    %c0_i32_0 = arith.constant 0 : i32
    %c0_i32_1 = arith.constant 0 : i32
    return %c0_i32, %c0_i32_0 : i32, i32
  }
  func.func @transform_6(%arg0: i32) -> (i32, i32, i32) {
    %c0_i32 = arith.constant 0 : i32
    %c0_i32_0 = arith.constant 0 : i32
    %c0_i32_1 = arith.constant 0 : i32
    return %arg0, %c0_i32, %c0_i32_0 : i32, i32, i32
  }
}

module attributes {stable_mosaic.version = 11 : i64} {
  func.func @kernel(%arg0: i32, %arg1: memref<1x16x384xbf16, #tpu.memory_space<vmem>>, %arg2: memref<1x16x384xbf16, #tpu.memory_space<vmem>>, %arg3: memref<16x288xbf16, #tpu.memory_space<vmem>>, %arg4: memref<1x384xf32, #tpu.memory_space<vmem>>, %arg5: memref<16x1xf32, #tpu.memory_space<vmem>>, %arg6: memref<16x1xf32, #tpu.memory_space<vmem>>, %arg7: memref<16x1xf32, #tpu.memory_space<vmem>>, %arg8: memref<1x16x384xbf16, #tpu.memory_space<vmem>>, %arg9: memref<288x384xbf16, #tpu.memory_space<vmem>>) attributes {dimension_semantics = [#tpu.dimension_semantics<parallel>], iteration_bounds = array<i64: 2>, scalar_prefetch = 0 : i64, scratch_operands = 1 : i64, tpu.core_type = #tpu.core_type<tc>, window_params = [{transform_indices = @transform_0, window_bounds = array<i64: 1, 16, 384>}, {transform_indices = @transform_1, window_bounds = array<i64: 1, 16, 384>}, {pipeline_mode = #tpu.pipeline_mode<synchronous>, transform_indices = @transform_2, window_bounds = array<i64: 16, 288>}, {pipeline_mode = #tpu.pipeline_mode<synchronous>, transform_indices = @transform_3, window_bounds = array<i64: 1, 384>}, {pipeline_mode = #tpu.pipeline_mode<synchronous>, transform_indices = @transform_4, window_bounds = array<i64: 16, 1>}, {pipeline_mode = #tpu.pipeline_mode<synchronous>, transform_indices = @transform_5, window_bounds = array<i64: 16, 1>}, {pipeline_mode = #tpu.pipeline_mode<synchronous>, transform_indices = @transform_6, window_bounds = array<i64: 16, 1>}, {transform_indices = @transform_7, window_bounds = array<i64: 1, 16, 384>}]} {
    %c0 = arith.constant 0 : index
    %c0_0 = arith.constant 0 : index
    %c0_1 = arith.constant 0 : index
    %0 = vector.load %arg1[%c0, %c0_0, %c0_1] : memref<1x16x384xbf16, #tpu.memory_space<vmem>>, vector<1x16x384xbf16>
    %1 = vector.shape_cast %0 : vector<1x16x384xbf16> to vector<16x384xbf16>
    %2 = vector.extract_strided_slice %1 {offsets = [0, 365], sizes = [16, 19], strides = [1, 1]} : vector<16x384xbf16> to vector<16x19xbf16>
    %3 = vector.extract_strided_slice %1 {offsets = [0, 0], sizes = [16, 365], strides = [1, 1]} : vector<16x384xbf16> to vector<16x365xbf16>
    %4 = tpu.concatenate %2, %3 in 1 : vector<16x19xbf16>, vector<16x365xbf16> -> vector<16x384xbf16>
    %c0_2 = arith.constant 0 : index
    %c0_3 = arith.constant 0 : index
    %5 = vector.load %arg9[%c0_2, %c0_3] : memref<288x384xbf16, #tpu.memory_space<vmem>>, vector<16x384xbf16>
    tpu.vector_store %arg9[%c0_2, %c0_3], %4 {strides = array<i32>} : memref<288x384xbf16, #tpu.memory_space<vmem>>, vector<16x384xbf16>,
    %6 = vector.extract_strided_slice %1 {offsets = [0, 366], sizes = [16, 18], strides = [1, 1]} : vector<16x384xbf16> to vector<16x18xbf16>
    %7 = vector.extract_strided_slice %1 {offsets = [0, 0], sizes = [16, 366], strides = [1, 1]} : vector<16x384xbf16> to vector<16x366xbf16>
    %8 = tpu.concatenate %6, %7 in 1 : vector<16x18xbf16>, vector<16x366xbf16> -> vector<16x384xbf16>
    %c16 = arith.constant 16 : index
    %c0_4 = arith.constant 0 : index
    %9 = vector.load %arg9[%c16, %c0_4] : memref<288x384xbf16, #tpu.memory_space<vmem>>, vector<16x384xbf16>
    tpu.vector_store %arg9[%c16, %c0_4], %8 {strides = array<i32>} : memref<288x384xbf16, #tpu.memory_space<vmem>>, vector<16x384xbf16>,
    %10 = vector.extract_strided_slice %1 {offsets = [0, 367], sizes = [16, 17], strides = [1, 1]} : vector<16x384xbf16> to vector<16x17xbf16>
    %11 = vector.extract_strided_slice %1 {offsets = [0, 0], sizes = [16, 367], strides = [1, 1]} : vector<16x384xbf16> to vector<16x367xbf16>
    %12 = tpu.concatenate %10, %11 in 1 : vector<16x17xbf16>, vector<16x367xbf16> -> vector<16x384xbf16>
    %c32 = arith.constant 32 : index
    %c0_5 = arith.constant 0 : index
    %13 = vector.load %arg9[%c32, %c0_5] : memref<288x384xbf16, #tpu.memory_space<vmem>>, vector<16x384xbf16>
    tpu.vector_store %arg9[%c32, %c0_5], %12 {strides = array<i32>} : memref<288x384xbf16, #tpu.memory_space<vmem>>, vector<16x384xbf16>,
    %14 = vector.extract_strided_slice %1 {offsets = [0, 383], sizes = [16, 1], strides = [1, 1]} : vector<16x384xbf16> to vector<16x1xbf16>
    %15 = vector.extract_strided_slice %1 {offsets = [0, 0], sizes = [16, 383], strides = [1, 1]} : vector<16x384xbf16> to vector<16x383xbf16>
    %16 = tpu.concatenate %14, %15 in 1 : vector<16x1xbf16>, vector<16x383xbf16> -> vector<16x384xbf16>
    %c48 = arith.constant 48 : index
    %c0_6 = arith.constant 0 : index
    %17 = vector.load %arg9[%c48, %c0_6] : memref<288x384xbf16, #tpu.memory_space<vmem>>, vector<16x384xbf16>
    tpu.vector_store %arg9[%c48, %c0_6], %16 {strides = array<i32>} : memref<288x384xbf16, #tpu.memory_space<vmem>>, vector<16x384xbf16>,
    %c64 = arith.constant 64 : index
    %c0_7 = arith.constant 0 : index
    %18 = vector.load %arg9[%c64, %c0_7] : memref<288x384xbf16, #tpu.memory_space<vmem>>, vector<16x384xbf16>
    tpu.vector_store %arg9[%c64, %c0_7], %1 {strides = array<i32>} : memref<288x384xbf16, #tpu.memory_space<vmem>>, vector<16x384xbf16>,
    %19 = vector.extract_strided_slice %1 {offsets = [0, 1], sizes = [16, 383], strides = [1, 1]} : vector<16x384xbf16> to vector<16x383xbf16>
    %20 = vector.extract_strided_slice %1 {offsets = [0, 0], sizes = [16, 1], strides = [1, 1]} : vector<16x384xbf16> to vector<16x1xbf16>
    %21 = tpu.concatenate %19, %20 in 1 : vector<16x383xbf16>, vector<16x1xbf16> -> vector<16x384xbf16>
    %c80 = arith.constant 80 : index
    %c0_8 = arith.constant 0 : index
    %22 = vector.load %arg9[%c80, %c0_8] : memref<288x384xbf16, #tpu.memory_space<vmem>>, vector<16x384xbf16>
    tpu.vector_store %arg9[%c80, %c0_8], %21 {strides = array<i32>} : memref<288x384xbf16, #tpu.memory_space<vmem>>, vector<16x384xbf16>,
    %23 = vector.extract_strided_slice %1 {offsets = [0, 17], sizes = [16, 367], strides = [1, 1]} : vector<16x384xbf16> to vector<16x367xbf16>
    %24 = vector.extract_strided_slice %1 {offsets = [0, 0], sizes = [16, 17], strides = [1, 1]} : vector<16x384xbf16> to vector<16x17xbf16>
    %25 = tpu.concatenate %23, %24 in 1 : vector<16x367xbf16>, vector<16x17xbf16> -> vector<16x384xbf16>
    %c96 = arith.constant 96 : index
    %c0_9 = arith.constant 0 : index
    %26 = vector.load %arg9[%c96, %c0_9] : memref<288x384xbf16, #tpu.memory_space<vmem>>, vector<16x384xbf16>
    tpu.vector_store %arg9[%c96, %c0_9], %25 {strides = array<i32>} : memref<288x384xbf16, #tpu.memory_space<vmem>>, vector<16x384xbf16>,
    %27 = vector.extract_strided_slice %1 {offsets = [0, 18], sizes = [16, 366], strides = [1, 1]} : vector<16x384xbf16> to vector<16x366xbf16>
    %28 = vector.extract_strided_slice %1 {offsets = [0, 0], sizes = [16, 18], strides = [1, 1]} : vector<16x384xbf16> to vector<16x18xbf16>
    %29 = tpu.concatenate %27, %28 in 1 : vector<16x366xbf16>, vector<16x18xbf16> -> vector<16x384xbf16>
    %c112 = arith.constant 112 : index
    %c0_10 = arith.constant 0 : index
    %30 = vector.load %arg9[%c112, %c0_10] : memref<288x384xbf16, #tpu.memory_space<vmem>>, vector<16x384xbf16>
    tpu.vector_store %arg9[%c112, %c0_10], %29 {strides = array<i32>} : memref<288x384xbf16, #tpu.memory_space<vmem>>, vector<16x384xbf16>,
    %31 = vector.extract_strided_slice %1 {offsets = [0, 19], sizes = [16, 365], strides = [1, 1]} : vector<16x384xbf16> to vector<16x365xbf16>
    %32 = vector.extract_strided_slice %1 {offsets = [0, 0], sizes = [16, 19], strides = [1, 1]} : vector<16x384xbf16> to vector<16x19xbf16>
    %33 = tpu.concatenate %31, %32 in 1 : vector<16x365xbf16>, vector<16x19xbf16> -> vector<16x384xbf16>
    %c128 = arith.constant 128 : index
    %c0_11 = arith.constant 0 : index
    %34 = vector.load %arg9[%c128, %c0_11] : memref<288x384xbf16, #tpu.memory_space<vmem>>, vector<16x384xbf16>
    tpu.vector_store %arg9[%c128, %c0_11], %33 {strides = array<i32>} : memref<288x384xbf16, #tpu.memory_space<vmem>>, vector<16x384xbf16>,
    %c0_12 = arith.constant 0 : index
    %c0_13 = arith.constant 0 : index
    %c0_14 = arith.constant 0 : index
    %35 = vector.load %arg2[%c0_12, %c0_13, %c0_14] : memref<1x16x384xbf16, #tpu.memory_space<vmem>>, vector<1x16x384xbf16>
    %36 = vector.shape_cast %35 : vector<1x16x384xbf16> to vector<16x384xbf16>
    %37 = vector.extract_strided_slice %36 {offsets = [0, 365], sizes = [16, 19], strides = [1, 1]} : vector<16x384xbf16> to vector<16x19xbf16>
    %38 = vector.extract_strided_slice %36 {offsets = [0, 0], sizes = [16, 365], strides = [1, 1]} : vector<16x384xbf16> to vector<16x365xbf16>
    %39 = tpu.concatenate %37, %38 in 1 : vector<16x19xbf16>, vector<16x365xbf16> -> vector<16x384xbf16>
    %c144 = arith.constant 144 : index
    %c0_15 = arith.constant 0 : index
    %40 = vector.load %arg9[%c144, %c0_15] : memref<288x384xbf16, #tpu.memory_space<vmem>>, vector<16x384xbf16>
    tpu.vector_store %arg9[%c144, %c0_15], %39 {strides = array<i32>} : memref<288x384xbf16, #tpu.memory_space<vmem>>, vector<16x384xbf16>,
    %41 = vector.extract_strided_slice %36 {offsets = [0, 366], sizes = [16, 18], strides = [1, 1]} : vector<16x384xbf16> to vector<16x18xbf16>
    %42 = vector.extract_strided_slice %36 {offsets = [0, 0], sizes = [16, 366], strides = [1, 1]} : vector<16x384xbf16> to vector<16x366xbf16>
    %43 = tpu.concatenate %41, %42 in 1 : vector<16x18xbf16>, vector<16x366xbf16> -> vector<16x384xbf16>
    %c160 = arith.constant 160 : index
    %c0_16 = arith.constant 0 : index
    %44 = vector.load %arg9[%c160, %c0_16] : memref<288x384xbf16, #tpu.memory_space<vmem>>, vector<16x384xbf16>
    tpu.vector_store %arg9[%c160, %c0_16], %43 {strides = array<i32>} : memref<288x384xbf16, #tpu.memory_space<vmem>>, vector<16x384xbf16>,
    %45 = vector.extract_strided_slice %36 {offsets = [0, 367], sizes = [16, 17], strides = [1, 1]} : vector<16x384xbf16> to vector<16x17xbf16>
    %46 = vector.extract_strided_slice %36 {offsets = [0, 0], sizes = [16, 367], strides = [1, 1]} : vector<16x384xbf16> to vector<16x367xbf16>
    %47 = tpu.concatenate %45, %46 in 1 : vector<16x17xbf16>, vector<16x367xbf16> -> vector<16x384xbf16>
    %c176 = arith.constant 176 : index
    %c0_17 = arith.constant 0 : index
    %48 = vector.load %arg9[%c176, %c0_17] : memref<288x384xbf16, #tpu.memory_space<vmem>>, vector<16x384xbf16>
    tpu.vector_store %arg9[%c176, %c0_17], %47 {strides = array<i32>} : memref<288x384xbf16, #tpu.memory_space<vmem>>, vector<16x384xbf16>,
    %49 = vector.extract_strided_slice %36 {offsets = [0, 383], sizes = [16, 1], strides = [1, 1]} : vector<16x384xbf16> to vector<16x1xbf16>
    %50 = vector.extract_strided_slice %36 {offsets = [0, 0], sizes = [16, 383], strides = [1, 1]} : vector<16x384xbf16> to vector<16x383xbf16>
    %51 = tpu.concatenate %49, %50 in 1 : vector<16x1xbf16>, vector<16x383xbf16> -> vector<16x384xbf16>
    %c192 = arith.constant 192 : index
    %c0_18 = arith.constant 0 : index
    %52 = vector.load %arg9[%c192, %c0_18] : memref<288x384xbf16, #tpu.memory_space<vmem>>, vector<16x384xbf16>
    tpu.vector_store %arg9[%c192, %c0_18], %51 {strides = array<i32>} : memref<288x384xbf16, #tpu.memory_space<vmem>>, vector<16x384xbf16>,
    %c208 = arith.constant 208 : index
    %c0_19 = arith.constant 0 : index
    %53 = vector.load %arg9[%c208, %c0_19] : memref<288x384xbf16, #tpu.memory_space<vmem>>, vector<16x384xbf16>
    tpu.vector_store %arg9[%c208, %c0_19], %36 {strides = array<i32>} : memref<288x384xbf16, #tpu.memory_space<vmem>>, vector<16x384xbf16>,
    %54 = vector.extract_strided_slice %36 {offsets = [0, 1], sizes = [16, 383], strides = [1, 1]} : vector<16x384xbf16> to vector<16x383xbf16>
    %55 = vector.extract_strided_slice %36 {offsets = [0, 0], sizes = [16, 1], strides = [1, 1]} : vector<16x384xbf16> to vector<16x1xbf16>
    %56 = tpu.concatenate %54, %55 in 1 : vector<16x383xbf16>, vector<16x1xbf16> -> vector<16x384xbf16>
    %c224 = arith.constant 224 : index
    %c0_20 = arith.constant 0 : index
    %57 = vector.load %arg9[%c224, %c0_20] : memref<288x384xbf16, #tpu.memory_space<vmem>>, vector<16x384xbf16>
    tpu.vector_store %arg9[%c224, %c0_20], %56 {strides = array<i32>} : memref<288x384xbf16, #tpu.memory_space<vmem>>, vector<16x384xbf16>,
    %58 = vector.extract_strided_slice %36 {offsets = [0, 17], sizes = [16, 367], strides = [1, 1]} : vector<16x384xbf16> to vector<16x367xbf16>
    %59 = vector.extract_strided_slice %36 {offsets = [0, 0], sizes = [16, 17], strides = [1, 1]} : vector<16x384xbf16> to vector<16x17xbf16>
    %60 = tpu.concatenate %58, %59 in 1 : vector<16x367xbf16>, vector<16x17xbf16> -> vector<16x384xbf16>
    %c240 = arith.constant 240 : index
    %c0_21 = arith.constant 0 : index
    %61 = vector.load %arg9[%c240, %c0_21] : memref<288x384xbf16, #tpu.memory_space<vmem>>, vector<16x384xbf16>
    tpu.vector_store %arg9[%c240, %c0_21], %60 {strides = array<i32>} : memref<288x384xbf16, #tpu.memory_space<vmem>>, vector<16x384xbf16>,
    %62 = vector.extract_strided_slice %36 {offsets = [0, 18], sizes = [16, 366], strides = [1, 1]} : vector<16x384xbf16> to vector<16x366xbf16>
    %63 = vector.extract_strided_slice %36 {offsets = [0, 0], sizes = [16, 18], strides = [1, 1]} : vector<16x384xbf16> to vector<16x18xbf16>
    %64 = tpu.concatenate %62, %63 in 1 : vector<16x366xbf16>, vector<16x18xbf16> -> vector<16x384xbf16>
    %c256 = arith.constant 256 : index
    %c0_22 = arith.constant 0 : index
    %65 = vector.load %arg9[%c256, %c0_22] : memref<288x384xbf16, #tpu.memory_space<vmem>>, vector<16x384xbf16>
    tpu.vector_store %arg9[%c256, %c0_22], %64 {strides = array<i32>} : memref<288x384xbf16, #tpu.memory_space<vmem>>, vector<16x384xbf16>,
    %66 = vector.extract_strided_slice %36 {offsets = [0, 19], sizes = [16, 365], strides = [1, 1]} : vector<16x384xbf16> to vector<16x365xbf16>
    %67 = vector.extract_strided_slice %36 {offsets = [0, 0], sizes = [16, 19], strides = [1, 1]} : vector<16x384xbf16> to vector<16x19xbf16>
    %68 = tpu.concatenate %66, %67 in 1 : vector<16x365xbf16>, vector<16x19xbf16> -> vector<16x384xbf16>
    %c272 = arith.constant 272 : index
    %c0_23 = arith.constant 0 : index
    %69 = vector.load %arg9[%c272, %c0_23] : memref<288x384xbf16, #tpu.memory_space<vmem>>, vector<16x384xbf16>
    tpu.vector_store %arg9[%c272, %c0_23], %68 {strides = array<i32>} : memref<288x384xbf16, #tpu.memory_space<vmem>>, vector<16x384xbf16>,
    %c0_24 = arith.constant 0 : index
    %c0_25 = arith.constant 0 : index
    %70 = vector.load %arg3[%c0_24, %c0_25] : memref<16x288xbf16, #tpu.memory_space<vmem>>, vector<16x288xbf16>
    %c0_26 = arith.constant 0 : index
    %c0_27 = arith.constant 0 : index
    %71 = vector.load %arg9[%c0_26, %c0_27] : memref<288x384xbf16, #tpu.memory_space<vmem>>, vector<288x384xbf16>
    %cst = arith.constant dense<0.000000e+00> : vector<16x384xf32>
    %72 = tpu.matmul %70, %71, %cst {dimension_numbers = #tpu.dot_dimension_numbers<[1], [0], [0], [1], [0, 0, 1, 1], [], []>} : vector<16x288xbf16>, vector<288x384xbf16>, vector<16x384xf32> -> vector<16x384xf32>
    %c0_28 = arith.constant 0 : index
    %c0_29 = arith.constant 0 : index
    %73 = vector.load %arg5[%c0_28, %c0_29] : memref<16x1xf32, #tpu.memory_space<vmem>>, vector<16x1xf32>
    %74 = vector.broadcast %73 : vector<16x1xf32> to vector<16x384xf32>
    %75 = arith.addf %72, %74 : vector<16x384xf32>
    %c0_30 = arith.constant 0 : index
    %c0_31 = arith.constant 0 : index
    %76 = vector.load %arg4[%c0_30, %c0_31] : memref<1x384xf32, #tpu.memory_space<vmem>>, vector<1x384xf32>
    %77 = vector.broadcast %76 : vector<1x384xf32> to vector<16x384xf32>
    %78 = arith.mulf %75, %77 : vector<16x384xf32>
    %cst_32 = arith.constant dense<0.000000e+00> : vector<16xf32>
    %79 = vector.multi_reduction <add>, %78, %cst_32 [1] : vector<16x384xf32> to vector<16xf32>
    %80 = vector.shape_cast %79 : vector<16xf32> to vector<16x1xf32>
    %81 = arith.mulf %78, %78 : vector<16x384xf32>
    %cst_33 = arith.constant dense<0.000000e+00> : vector<16xf32>
    %82 = vector.multi_reduction <add>, %81, %cst_33 [1] : vector<16x384xf32> to vector<16xf32>
    %83 = vector.shape_cast %82 : vector<16xf32> to vector<16x1xf32>
    %cst_34 = arith.constant 3.906250e-03 : f32
    %84 = vector.broadcast %cst_34 : f32 to vector<16x1xf32>
    %85 = arith.mulf %80, %84 : vector<16x1xf32>
    %cst_35 = arith.constant 3.906250e-03 : f32
    %86 = vector.broadcast %cst_35 : f32 to vector<16x1xf32>
    %87 = arith.mulf %83, %86 : vector<16x1xf32>
    %88 = arith.mulf %85, %85 : vector<16x1xf32>
    %89 = arith.subf %87, %88 : vector<16x1xf32>
    %cst_36 = arith.constant 0.000000e+00 : f32
    %90 = vector.broadcast %cst_36 : f32 to vector<16x1xf32>
    %91 = arith.maximumf %89, %90 : vector<16x1xf32>
    %92 = vector.broadcast %85 : vector<16x1xf32> to vector<16x384xf32>
    %93 = arith.subf %75, %92 : vector<16x384xf32>
    %cst_37 = arith.constant 9.99999974E-6 : f32
    %94 = vector.broadcast %cst_37 : f32 to vector<16x1xf32>
    %95 = arith.addf %91, %94 : vector<16x1xf32>
    %96 = math.rsqrt %95 : vector<16x1xf32>
    %97 = vector.broadcast %96 : vector<16x1xf32> to vector<16x384xf32>
    %98 = arith.mulf %93, %97 : vector<16x384xf32>
    %c0_38 = arith.constant 0 : index
    %c0_39 = arith.constant 0 : index
    %99 = vector.load %arg6[%c0_38, %c0_39] : memref<16x1xf32, #tpu.memory_space<vmem>>, vector<16x1xf32>
    %100 = vector.broadcast %99 : vector<16x1xf32> to vector<16x384xf32>
    %101 = arith.mulf %98, %100 : vector<16x384xf32>
    %c0_40 = arith.constant 0 : index
    %c0_41 = arith.constant 0 : index
    %102 = vector.load %arg7[%c0_40, %c0_41] : memref<16x1xf32, #tpu.memory_space<vmem>>, vector<16x1xf32>
    %103 = vector.broadcast %102 : vector<16x1xf32> to vector<16x384xf32>
    %104 = arith.addf %101, %103 : vector<16x384xf32>
    %cst_42 = arith.constant 1.000000e-01 : f32
    %105 = vector.broadcast %cst_42 : f32 to vector<16x384xf32>
    %106 = arith.mulf %105, %104 : vector<16x384xf32>
    %107 = arith.maximumf %104, %106 : vector<16x384xf32>
    %108 = vector.broadcast %76 : vector<1x384xf32> to vector<16x384xf32>
    %109 = arith.mulf %107, %108 : vector<16x384xf32>
    %110 = arith.truncf %109 : vector<16x384xf32> to vector<16x384xbf16>
    %c0_43 = arith.constant 0 : index
    %c0_44 = arith.constant 0 : index
    %c0_45 = arith.constant 0 : index
    %111 = vector.load %arg8[%c0_43, %c0_44, %c0_45] : memref<1x16x384xbf16, #tpu.memory_space<vmem>>, vector<1x16x384xbf16>
    %112 = vector.shape_cast %111 : vector<1x16x384xbf16> to vector<16x384xbf16>
    %113 = vector.shape_cast %110 : vector<16x384xbf16> to vector<1x16x384xbf16>
    tpu.vector_store %arg8[%c0_43, %c0_44, %c0_45], %113 {strides = array<i32>} : memref<1x16x384xbf16, #tpu.memory_space<vmem>>, vector<1x16x384xbf16>,
    return
  }
  func.func @transform_0(%arg0: i32) -> (i32, i32, i32) {
    %c0_i32 = arith.constant 0 : i32
    %c0_i32_0 = arith.constant 0 : i32
    %c0_i32_1 = arith.constant 0 : i32
    return %arg0, %c0_i32, %c0_i32_0 : i32, i32, i32
  }
  func.func @transform_1(%arg0: i32) -> (i32, i32, i32) {
    %c0_i32 = arith.constant 0 : i32
    %c0_i32_0 = arith.constant 0 : i32
    %c0_i32_1 = arith.constant 0 : i32
    return %arg0, %c0_i32, %c0_i32_0 : i32, i32, i32
  }
  func.func @transform_2(%arg0: i32) -> (i32, i32) {
    %c0_i32 = arith.constant 0 : i32
    %c0_i32_0 = arith.constant 0 : i32
    %c0_i32_1 = arith.constant 0 : i32
    return %c0_i32, %c0_i32_0 : i32, i32
  }
  func.func @transform_3(%arg0: i32) -> (i32, i32) {
    %c0_i32 = arith.constant 0 : i32
    %c0_i32_0 = arith.constant 0 : i32
    %c0_i32_1 = arith.constant 0 : i32
    return %c0_i32, %c0_i32_0 : i32, i32
  }
  func.func @transform_4(%arg0: i32) -> (i32, i32) {
    %c0_i32 = arith.constant 0 : i32
    %c0_i32_0 = arith.constant 0 : i32
    %c0_i32_1 = arith.constant 0 : i32
    return %c0_i32, %c0_i32_0 : i32, i32
  }
  func.func @transform_5(%arg0: i32) -> (i32, i32) {
    %c0_i32 = arith.constant 0 : i32
    %c0_i32_0 = arith.constant 0 : i32
    %c0_i32_1 = arith.constant 0 : i32
    return %c0_i32, %c0_i32_0 : i32, i32
  }
  func.func @transform_6(%arg0: i32) -> (i32, i32) {
    %c0_i32 = arith.constant 0 : i32
    %c0_i32_0 = arith.constant 0 : i32
    %c0_i32_1 = arith.constant 0 : i32
    return %c0_i32, %c0_i32_0 : i32, i32
  }
  func.func @transform_7(%arg0: i32) -> (i32, i32, i32) {
    %c0_i32 = arith.constant 0 : i32
    %c0_i32_0 = arith.constant 0 : i32
    %c0_i32_1 = arith.constant 0 : i32
    return %arg0, %c0_i32, %c0_i32_0 : i32, i32, i32
  }
}

</mosaic_0001>

<bundles_post_ra>
// kernel: tile.8
= control target key start
LH: loop header
LB: loop body
LE: loop exit
PB: predicated region body
PF: predicated region fallthrough
CT: control target
= control target key end

     0   :  { %s22_s0 = inlined_call_operand.vmem [shape: f32[4], index: 0, kind: input, shape index: {}]   ;;  %s23_s1 = inlined_call_operand.vmem [shape: f32[4,4], index: 1, kind: output, shape index: {}]  }
   0x1   :  { %v4_v0 = vld [vmem:[%s22_s0] ss:$0 sm:$0xff] }
   0x2   :  { %5 = vst [vmem:[%s23_s1] sm:$0xf] %v4_v0 }

// kernel: tile.0
= control target key start
LH: loop header
LB: loop body
LE: loop exit
PB: predicated region body
PF: predicated region fallthrough
CT: control target
= control target key end

     0   :  { %s34_s8 = smov 125   ;;  %vm7_vm0 = vcmask 7168   ;;  %s35_s11 = smov 126   ;;  %s61_s0 = inlined_call_operand.vmem [shape: f32[4,4], index: 0, kind: input, shape index: {}]   ;;  %s62_s1 = inlined_call_operand.vmem [shape: f32[16,1], index: 1, kind: output, shape index: {}]  }
   0x1   :  { %v4_v0 = vld [vmem:[%s61_s0] sm:$0xf]  ;;  %s33_s0 = smov 127  }
   0x2   :  { %5 = vst [vmem:[#allocation0] sm:$0xf] %v4_v0 }
   0x9   :  { %v9_v1 = vld [vmem:[#allocation0] sm:$0xf]  }
   0xa   :  { %v21_v2 = vld [vmem:[#allocation0] sm:$0xf]   ;;  %10 = vrot.lane.b32.xlu0 %v9_v1, %s33_s0 }
   0xb   :  { %22 = vrot.lane.b32.xlu1 %v21_v2, %s34_s8  ;;  %v6_v3 = vld [vmem:[#allocation0] sm:$0xf]  }
   0xc   :  { %v15_v4 = vld [vmem:[#allocation0] sm:$0xf]   ;;  %8 = vst.msk [vmem:[%s62_s1] ss:$4 sm:$0xf] %vm7_vm0, %v6_v3  }
   0xe   :  { %16 = vrot.lane.b32.xlu0 %v15_v4, %s35_s11 }
  0x7c   :  { %v11_v5 = vpop.permute.xlu0 %10  }
  0x7d   :  { %v23_v6 = vpop.permute.xlu1 %22   ;;  %27 = vst.msk [vmem:[%s62_s1 + $0x1] ss:$4 sm:$0xf] %vm7_vm0, %v11_v5  }
  0x7e   :  { %29 = vst.msk [vmem:[%s62_s1 + $0x3] ss:$4 sm:$0xf] %vm7_vm0, %v23_v6  }
  0x80   :  { %v17_v7 = vpop.permute.xlu0 %16  }
  0x81   :  { %28 = vst.msk [vmem:[%s62_s1 + $0x2] ss:$4 sm:$0xf] %vm7_vm0, %v17_v7  }

// kernel: upcat_forward.3
= control target key start
LH: loop header
LB: loop body
LE: loop exit
PB: predicated region body
PF: predicated region fallthrough
CT: control target
= control target key end

     0   :  { %s465_s12 = smov 0   ;;  %s467_s13 = smov 0   ;;  %s507_s0 = inlined_call_operand.vmem [shape: bf16[2,8,128], index: 0, kind: input, shape index: {}]   ;;  %s508_s1 = inlined_call_operand.vmem [shape: bf16[16,8], index: 1, kind: input, shape index: {}]   ;;  %s509_s2 = inlined_call_operand.vmem [shape: f32[16,1], index: 2, kind: input, shape index: {}]   ;;  %s510_s3 = inlined_call_operand.vmem [shape: bf16[2,16,128], index: 3, kind: output, shape index: {}]  }
   0x1   :  { %s469_s14 = smov 0  }
   0x2 LB: > { %s25_s15 = sadd.s32 1, %s436_s13  ;;  %p363_p0 = scmp.ge.s32.totalorder %s440_s14, 1  ;;  %s440_s14 = sphi %s469_s14, %s13_s14   ;;  %s436_s13 = sphi %s467_s13, %s512_s13   ;;  %s432_s12 = sphi %s465_s12, %s511_s12  }
   0x3   : > { %p27_p1 = scmp.ge.s32.totalorder %s25_s15, 2  ;;  %p155_p2 = scmp.lt.s32.totalorder %s440_s14, 3 }
   0x5   : > { %s514_s15 = smov (%p27_p1, %s25_s15), 0  ;;  %p156_p3 = pnand %p363_p0, %p155_p2 }
   0x6   : > { %p184_p4 = scmp.lt.s32.totalorder (!%p156_p3), %s432_s12, 1  ;;  %v442_v0 = vmov (!%p156_p3), 0.0   ;;  %vm443_vm0 = vmmov (!%p156_p3), 0   ;;  %v203_v1 = vld [vmem:[%s509_s2] sm:$0xff] (!%p156_p3)  ;;  %v444_v2 = vmov (!%p156_p3), 0   ;;  %vm224_vm1 = vcmask (!%p156_p3), 1043456  }
   0x7   : > { %159 = sbr.rel (%p156_p3) target bundleno = 241 (0xf1), region = 32  ;;  %383 = vmatprep.subr.bf16.mxu0 (!%p156_p3), %v442_v0  ;;  %385 = vmatprep.mubr.msk.bf16.mxu0 (!%p156_p3), %vm443_vm0, %v442_v0  ;;  %v204_v3 = vld [vmem:[%s509_s2 + $0x8] sm:$0xff] (!%p156_p3)  ;;  %v417_v6 = vld [vmem:[%s508_s1] sm:$0xff] (!%p156_p3)   ;;  %vm220_vm2 = vcmask (!%p156_p3), 64512  }
   0x8   : > { %416 = vset.pattern.permute.xlu0 (!%p156_p3), %v444_v2 }
   0x9   : > { %207 = vperm.xlu0 (!%p156_p3), %416, %v203_v1  }
   0xd   : > { %212 = vperm.xlu0 (!%p156_p3), %416, %v204_v3  }
   0xe   : > { %s516_s12 = smov (!%p184_p4, %s432_s12), 1 }
   0xf   : > { %s364_s18 = sshll.u32 %s516_s12, 2  ;;  %s373_s26 = sshll.u32 %s516_s12, 3 }
  0x10   : > { %s190_s23 = scalar_lea.vmem %s507_s0, %s364_s18  ;;  %s198_s29 = scalar_lea.vmem %s510_s3, %s373_s26 }
  0x11   : > { %v202_v4 = vld [vmem:[%s190_s23] sm:$0xf] }
  0x12   : > { %v226_v5 = vsel %vm224_vm1, %v202_v4, 0 }
  0x13   : > { %384 = vmatpush3.bf16.msra.mxu0 %v226_v5 }
  0x16   : > { %386 = vmatmul.mubr.msk.bf16.vlgmr.msra.gmra.mrb[0].mxu0 %vm220_vm2, %v417_v6 }
  0x88   : > { %v208_v7 = vpop.permute.xlu0 %207 }
  0x8c   : > { %v213_v10 = vpop.permute.xlu0 %212 }
  0xe9   : > { %v262_v8 = vpop.f32.mrb[0].mxu0 }
  0xea   : > { %v387_v9 = vpop.f32.mrb[1].mxu0  ;;  %v263_v12 = vadd.f32 %v262_v8, %v208_v7 }
  0xeb   : > { %v265_v11 = vpop.f32.mrb[2].mxu0 }
  0xec   : > { %v266_v13 = vadd.f32 %v265_v11, %v213_v10  ;;  %v388_v14 = vpop.f32.mrb[3].mxu0 }
  0xee   : > { %v379_v15 = vpack.c.bf16 %v266_v13, %v263_v12 }
  0xf0   : > { %380 = vst [vmem:[%s198_s29] sm:$0xff] %v379_v15  }
  0xf1 PF: > { %s13_s14 = sadd.s32 1, %s440_s14   ;;  %s511_s12 = smov %s436_s13 }
  0xf2   : > { %p10_p5 = scmp.ge.s32.totalorder %s13_s14, 4   ;;  %s512_s13 = smov %s514_s15 }
  0xf4   :  { %12 = sbr.rel (!%p10_p5) target bundleno = 2 (0x2), region = 62 }

// kernel: upcat_forward.5
= control target key start
LH: loop header
LB: loop body
LE: loop exit
PB: predicated region body
PF: predicated region fallthrough
CT: control target
= control target key end

     0   :  { %s852_s21 = smov 0   ;;  %s978_s0 = inlined_call_operand.vmem [shape: bf16[2,16,384], index: 0, kind: input, shape index: {}]   ;;  %s979_s1 = inlined_call_operand.vmem [shape: bf16[16,144], index: 1, kind: input, shape index: {}]   ;;  %s980_s2 = inlined_call_operand.vmem [shape: f32[1,384], index: 2, kind: input, shape index: {}]   ;;  %s981_s3 = inlined_call_operand.vmem [shape: f32[16,1], index: 3, kind: input, shape index: {}]   ;;  %s982_s4 = inlined_call_operand.vmem [shape: f32[16,1], index: 4, kind: input, shape index: {}]   ;;  %s983_s5 = inlined_call_operand.vmem [shape: f32[16,1], index: 5, kind: input, shape index: {}]   ;;  %s984_s6 = inlined_call_operand.vmem [shape: f32[2,16,384], index: 6, kind: output, shape index: {}]  }
   0x1 LB: > { %s752_s22 = sadd.s32 4294967295, %s806_s21   ;;  %p756_p0 = scmp.ge.s32.totalorder %s806_s21, 1  ;;  %s806_s21 = sphi %s852_s21, %s16_s21  }
   0x2   : > { %p212_p1 = scmp.lt.s32.totalorder %s806_s21, 3 }
   0x4   : > { %p213_p2 = pnand %p756_p0, %p212_p1 }
   0x5   : > { %p242_p3 = scmp.lt.s32.totalorder (!%p213_p2), %s752_s22, 1  ;;  %v808_v0 = vmov (!%p213_p2), 0   ;;  %s809_s27 = smov (!%p213_p2), 19   ;;  %v795_v4 = vld [vmem:[%s979_s1 + $0x4] ss:$8 sps:$4 sm:$0xff] (!%p213_p2)   ;;  %vm478_vm0 = vcmask (!%p213_p2), 130048   ;;  %v568_v58 = vlaneseq (!%p213_p2) }
   0x6   : > { %216 = sbr.rel (%p213_p2) target bundleno = 584 (0x248), region = 44  ;;  %525 = vmatprep.subr.bf16.mxu1 (!%p213_p2), %v808_v0  ;;  %788 = vset.pattern.permute.xlu1 (!%p213_p2), %v808_v0  ;;  %s810_s28 = smov (!%p213_p2), 18   ;;  %v458_v5 = vld [vmem:[%s981_s3 + $0x8] sm:$0xff] (!%p213_p2)  ;;  %v457_v6 = vld [vmem:[%s981_s3] sm:$0xff] (!%p213_p2)  ;;  %vm276_vm1 = vcmask (!%p213_p2), 154624   ;;  %vm295_vm2 = vcmask (!%p213_p2), 146432  }
   0x7   : > { %787 = vset.pattern.permute.xlu0 (!%p213_p2), %v808_v0  ;;  %s811_s29 = smov (!%p213_p2), 17   ;;  %s812_s30 = smov (!%p213_p2), 1   ;;  %764 = vmatprep.mubr.msk.bf16.mxu0 (!%p213_p2), %vm478_vm0, %v795_v4  ;;  %v638_v7 = vld [vmem:[%s982_s4 + $0x8] sm:$0xff] (!%p213_p2)  ;;  %v637_v8 = vld [vmem:[%s982_s4] sm:$0xff] (!%p213_p2)  ;;  %vm314_vm3 = vcmask (!%p213_p2), 138240   ;;  %vm333_vm4 = vcmask (!%p213_p2), 7168  }
   0x8   : > { %s813_s7 = smov (!%p213_p2), 127   ;;  %s814_s8 = smov (!%p213_p2), 111   ;;  %765 = vmatprep.mubr.msk.bf16.mxu1 (!%p213_p2), %vm478_vm0, %v795_v4  ;;  %vm358_vm5 = vcmask (!%p213_p2), 1039360   ;;  %vm377_vm6 = vcmask (!%p213_p2), 908288   ;;  %vm396_vm7 = vcmask (!%p213_p2), 900096   ;;  %vm415_vm8 = vcmask (!%p213_p2), 891904  }
   0x9   : > { %s815_s11 = smov (!%p213_p2), 110   ;;  %s816_s12 = smov (!%p213_p2), 109   ;;  %v793_v57 = vld [vmem:[%s979_s1] ss:$8 sps:$4 sm:$0xff] (!%p213_p2)   ;;  %v569_v59 = vshrl.u32 (!%p213_p2), %v568_v58, 7 }
   0xa   : > { %v566_v61 = vld [vmem:[%s980_s2] sm:$0x7] (!%p213_p2) }
   0xb   : > { %v570_v60 = vsub.s32 (!%p213_p2), 0, %v569_v59  ;;  %v578_v62 = vsub.s32 (!%p213_p2), 2, %v569_v59  ;;  %v574_v63 = vsub.s32 (!%p213_p2), 1, %v569_v59 }
   0xd   : > { %s986_s22 = smov (!%p242_p3, %s752_s22), 1 }
   0xe   : > { %s768_s23 = smul.u32 24, %s986_s22 }
  0x10   : > { %s246_s26 = scalar_lea.vmem %s978_s0, %s768_s23 }
  0x11   : > { %v869_v1 = vld [vmem:[%s246_s26 + $0x8] ss:$12 sps:$4 sm:$0xff]   ;;  %v871_v2 = vld [vmem:[%s246_s26] ss:$12 sps:$4 sm:$0xff]   ;;  %v875_v3 = vld [vmem:[%s246_s26 + $0x4] ss:$12 sps:$4 sm:$0xff]  }
  0x12   : > { %262 = vrot.lane.b32.xlu1 %v869_v1, %s809_s27  ;;  %272 = vrot.lane.b32.xlu0 %v871_v2, %s809_s27 }
  0x16   : > { %291 = vrot.lane.b32.xlu1 %v871_v2, %s810_s28  ;;  %274 = vrot.lane.b32.xlu0 %v875_v3, %s809_s27 }
  0x1a   : > { %289 = vrot.lane.b32.xlu1 %v869_v1, %s810_s28  ;;  %293 = vrot.lane.b32.xlu0 %v875_v3, %s810_s28 }
  0x1e   : > { %312 = vrot.lane.b32.xlu1 %v875_v3, %s811_s29  ;;  %310 = vrot.lane.b32.xlu0 %v871_v2, %s811_s29 }
  0x22   : > { %329 = vrot.lane.b32.xlu1 %v871_v2, %s812_s30  ;;  %308 = vrot.lane.b32.xlu0 %v869_v1, %s811_s29 }
  0x26   : > { %327 = vrot.lane.b32.xlu1 %v869_v1, %s812_s30  ;;  %331 = vrot.lane.b32.xlu0 %v875_v3, %s812_s30 }
  0x2a   : > { %356 = vrot.lane.b32.xlu1 %v869_v1, %s813_s7  ;;  %354 = vrot.lane.b32.xlu0 %v875_v3, %s813_s7 }
  0x2e   : > { %373 = vrot.lane.b32.xlu1 %v875_v3, %s814_s8  ;;  %352 = vrot.lane.b32.xlu0 %v871_v2, %s813_s7  ;;  %s769_s7 = smul.u32 48, %s986_s22 }
  0x30   : > { %s251_s10 = scalar_lea.vmem %s984_s6, %s769_s7 }
  0x32   : > { %371 = vrot.lane.b32.xlu1 %v871_v2, %s814_s8  ;;  %375 = vrot.lane.b32.xlu0 %v869_v1, %s814_s8 }
  0x36   : > { %394 = vrot.lane.b32.xlu1 %v869_v1, %s815_s11  ;;  %392 = vrot.lane.b32.xlu0 %v875_v3, %s815_s11 }
  0x3a   : > { %411 = vrot.lane.b32.xlu1 %v875_v3, %s816_s12  ;;  %390 = vrot.lane.b32.xlu0 %v871_v2, %s815_s11 }
  0x3e   : > { %409 = vrot.lane.b32.xlu1 %v871_v2, %s816_s12  ;;  %413 = vrot.lane.b32.xlu0 %v869_v1, %s816_s12 }
  0x42   : > { %466 = vperm.xlu1 %788, %v458_v5   ;;  %461 = vperm.xlu0 %787, %v457_v6   ;;  %v935_v6 = vrot.slane %v566_v61, %v578_v62 }
  0x46   : > { %646 = vperm.xlu1 %788, %v638_v7   ;;  %641 = vperm.xlu0 %787, %v637_v8   ;;  %v937_v7 = vrot.slane %v566_v61, %v574_v63 }
  0x84   : > { %v263_v9 = vpop.permute.xlu1 %262  ;;  %v273_v10 = vpop.permute.xlu0 %272 }
  0x85   : > { %v284_v15 = vsel %vm276_vm1, %v263_v9, %v273_v10 }
  0x88   : > { %v292_v11 = vpop.permute.xlu1 %291  ;;  %v275_v12 = vpop.permute.xlu0 %274 }
  0x89   : > { %v277_v13 = vsel %vm276_vm1, %v273_v10, %v275_v12  ;;  %v278_v14 = vsel %vm276_vm1, %v275_v12, %v263_v9 }
  0x8a   : > { %482 = vmatprep.subr.bf16.mxu0 %v277_v13  ;;  %526 = vmatpush1.bf16.msra.mxu1 %v278_v14 }
  0x8b   : > { %483 = vmatpush1.bf16.msra.mxu0 %v284_v15  ;;  %527 = vmatprep.subr.bf16.mxu1 %v808_v0 }
  0x8c   : > { %v290_v16 = vpop.permute.xlu1 %289  ;;  %v294_v17 = vpop.permute.xlu0 %293 }
  0x8d   : > { %v303_v18 = vsel %vm295_vm2, %v290_v16, %v292_v11  ;;  %v296_v19 = vsel %vm295_vm2, %v292_v11, %v294_v17  ;;  %v297_v20 = vsel %vm295_vm2, %v294_v17, %v290_v16 }
  0x8e   : > { %484 = vmatprep.subr.bf16.mxu0 %v296_v19  ;;  %528 = vmatpush1.bf16.msra.mxu1 %v297_v20 }
  0x8f   : > { %485 = vmatpush1.bf16.msra.mxu0 %v303_v18  ;;  %529 = vmatprep.subr.bf16.mxu1 %v808_v0 }
  0x90   : > { %v313_v21 = vpop.permute.xlu1 %312  ;;  %v311_v22 = vpop.permute.xlu0 %310 }
  0x91   : > { %v315_v23 = vsel %vm314_vm3, %v311_v22, %v313_v21 }
  0x92   : > { %486 = vmatprep.subr.bf16.mxu0 %v315_v23 }
  0x94   : > { %v330_v24 = vpop.permute.xlu1 %329  ;;  %v309_v25 = vpop.permute.xlu0 %308 }
  0x95   : > { %v322_v26 = vsel %vm314_vm3, %v309_v25, %v311_v22  ;;  %v316_v27 = vsel %vm314_vm3, %v313_v21, %v309_v25 }
  0x96   : > { %487 = vmatpush1.bf16.msra.mxu0 %v322_v26  ;;  %530 = vmatpush1.bf16.msra.mxu1 %v316_v27 }
  0x97   : > { %531 = vmatprep.subr.bf16.mxu1 %v808_v0 }
  0x98   : > { %v328_v28 = vpop.permute.xlu1 %327  ;;  %v332_v29 = vpop.permute.xlu0 %331 }
  0x99   : > { %v341_v30 = vsel %vm333_vm4, %v328_v28, %v330_v24  ;;  %v334_v31 = vsel %vm333_vm4, %v330_v24, %v332_v29  ;;  %v335_v32 = vsel %vm333_vm4, %v332_v29, %v328_v28 }
  0x9a   : > { %488 = vmatprep.subr.bf16.mxu0 %v334_v31  ;;  %532 = vmatpush1.bf16.msra.mxu1 %v335_v32 }
  0x9b   : > { %489 = vmatpush1.bf16.msra.mxu0 %v341_v30  ;;  %533 = vmatprep.subr.bf16.mxu1 %v808_v0 }
  0x9c   : > { %v357_v33 = vpop.permute.xlu1 %356  ;;  %v355_v34 = vpop.permute.xlu0 %354  ;;  %490 = vmatprep.subr.bf16.mxu0 %v875_v3 }
  0x9d   : > { %v360_v36 = vsel %vm358_vm5, %v355_v34, %v357_v33 }
  0x9e   : > { %534 = vmatpush1.bf16.msra.mxu1 %v869_v1 }
  0x9f   : > { %491 = vmatpush1.bf16.msra.mxu0 %v871_v2  ;;  %535 = vmatprep.subr.bf16.mxu1 %v808_v0  ;;  %v931_v2 = vrot.slane %v566_v61, %v570_v60 }
  0xa0   : > { %v374_v35 = vpop.permute.xlu1 %373  ;;  %492 = vmatprep.subr.bf16.mxu0 %v360_v36  ;;  %v353_v37 = vpop.permute.xlu0 %352 }
  0xa1   : > { %v366_v38 = vsel %vm358_vm5, %v357_v33, %v353_v37  ;;  %v359_v39 = vsel %vm358_vm5, %v353_v37, %v355_v34 }
  0xa2   : > { %536 = vmatpush1.bf16.msra.mxu1 %v366_v38 }
  0xa3   : > { %493 = vmatpush1.bf16.msra.mxu0 %v359_v39  ;;  %537 = vmatprep.subr.bf16.mxu1 %v808_v0  ;;  %v655_v39 = vld [vmem:[%s983_s5] sm:$0xff] }
  0xa4   : > { %v372_v40 = vpop.permute.xlu1 %371  ;;  %v376_v41 = vpop.permute.xlu0 %375 }
  0xa5   : > { %v378_v42 = vsel %vm377_vm6, %v372_v40, %v374_v35  ;;  %v379_v43 = vsel %vm377_vm6, %v374_v35, %v376_v41  ;;  %v385_v44 = vsel %vm377_vm6, %v376_v41, %v372_v40  ;;  %v656_v40 = vld [vmem:[%s983_s5 + $0x8] sm:$0xff] }
  0xa6   : > { %494 = vmatprep.subr.bf16.mxu0 %v379_v43  ;;  %538 = vmatpush1.bf16.msra.mxu1 %v385_v44 }
  0xa7   : > { %495 = vmatpush1.bf16.msra.mxu0 %v378_v42  ;;  %539 = vmatprep.subr.bf16.mxu1 %v808_v0 }
  0xa8   : > { %v395_v45 = vpop.permute.xlu1 %394  ;;  %v393_v46 = vpop.permute.xlu0 %392 }
  0xa9   : > { %v398_v47 = vsel %vm396_vm7, %v393_v46, %v395_v45 }
  0xaa   : > { %496 = vmatprep.subr.bf16.mxu0 %v398_v47 }
  0xac   : > { %v412_v48 = vpop.permute.xlu1 %411  ;;  %v391_v49 = vpop.permute.xlu0 %390 }
  0xad   : > { %v397_v50 = vsel %vm396_vm7, %v391_v49, %v393_v46  ;;  %v404_v51 = vsel %vm396_vm7, %v395_v45, %v391_v49 }
  0xae   : > { %497 = vmatpush1.bf16.msra.mxu0 %v397_v50  ;;  %540 = vmatpush1.bf16.msra.mxu1 %v404_v51 }
  0xaf   : > { %541 = vmatprep.subr.bf16.mxu1 %v808_v0 }
  0xb0   : > { %v410_v52 = vpop.permute.xlu1 %409  ;;  %v414_v53 = vpop.permute.xlu0 %413 }
  0xb1   : > { %v416_v54 = vsel %vm415_vm8, %v410_v52, %v412_v48  ;;  %v417_v55 = vsel %vm415_vm8, %v412_v48, %v414_v53  ;;  %v423_v56 = vsel %vm415_vm8, %v414_v53, %v410_v52 }
  0xb2   : > { %498 = vmatprep.subr.bf16.mxu0 %v417_v55  ;;  %542 = vmatpush1.bf16.msra.mxu1 %v423_v56 }
  0xb3   : > { %499 = vmatpush1.bf16.msra.mxu0 %v416_v54 }
  0xb5   : > { %558 = vmatmul.mubr.bf16.vlgmr.msra.gmra.mrb[0].mxu1 %v793_v57 }
  0xb6   : > { %515 = vmatmul.mubr.bf16.vlgmr.msra.gmra.mrb[0].mxu0 %v793_v57 }
  0xc1   : > { %v462_v0 = vpop.permute.xlu0 %461  ;;  %v467_v1 = vpop.permute.xlu1 %466 }
  0xc5   : > { %v647_v41 = vpop.permute.xlu1 %646  ;;  %v642_v42 = vpop.permute.xlu0 %641 }
 0x188   : > { %v559_v3 = vpop.f32.mrb[0].mxu1 }
 0x189   : > { %v516_v4 = vpop.f32.mrb[0].mxu0  ;;  %v933_v5 = vadd.f32 %v559_v3, %v462_v0  ;;  %v561_v8 = vpop.f32.mrb[1].mxu1 }
 0x18a   : > { %v939_v9 = vadd.f32 %v516_v4, %v462_v0  ;;  %v518_v10 = vpop.f32.mrb[1].mxu0  ;;  %v562_v11 = vpop.f32.mrb[2].mxu1 }
 0x18b   : > { %v941_v12 = vadd.f32 %v518_v10, %v462_v0  ;;  %v520_v13 = vpop.f32.mrb[2].mxu0  ;;  %v943_v14 = vadd.f32 %v562_v11, %v467_v1  ;;  %v564_v15 = vpop.f32.mrb[3].mxu1  ;;  %v585_v19 = vmul.f32 %v935_v6, %v933_v5 }
 0x18c   : > { %v583_v16 = vmul.f32 %v931_v2, %v939_v9  ;;  %v521_v17 = vadd.f32 %v520_v13, %v467_v1  ;;  %v522_v18 = vpop.f32.mrb[3].mxu0 }
 0x18d   : > { %v584_v20 = vmul.f32 %v937_v7, %v941_v12  ;;  %v523_v21 = vadd.f32 %v522_v18, %v467_v1  ;;  %v588_v23 = vmul.f32 %v935_v6, %v943_v14  ;;  %v599_v32 = vmul.f32 %v585_v19, %v585_v19 }
 0x18e   : > { %v586_v22 = vmul.f32 %v931_v2, %v521_v17  ;;  %v597_v24 = vmul.f32 %v583_v16, %v583_v16 }
 0x18f   : > { %v598_v25 = vmul.f32 %v584_v20, %v584_v20  ;;  %v587_v26 = vmul.f32 %v937_v7, %v523_v21  ;;  %v589_v27 = vadd.f32 %v584_v20, %v583_v16  ;;  %v602_v34 = vmul.f32 %v588_v23, %v588_v23 }
 0x190   : > { %v600_v28 = vmul.f32 %v586_v22, %v586_v22 }
 0x191   : > { %v601_v29 = vmul.f32 %v587_v26, %v587_v26  ;;  %v590_v30 = vadd.f32 %v589_v27, %v585_v19  ;;  %v593_v31 = vadd.f32 %v587_v26, %v586_v22  ;;  %v603_v36 = vadd.f32 %v598_v25, %v597_v24 }
 0x193   : > { %591 = vadd.xlane.f32.xlu1 %v590_v30  ;;  %v594_v33 = vadd.f32 %v593_v31, %v588_v23  ;;  %v607_v35 = vadd.f32 %v601_v29, %v600_v28  ;;  %v604_v38 = vadd.f32 %v603_v36, %v599_v32 }
 0x195   : > { %595 = vadd.xlane.f32.xlu0 %v594_v33  ;;  %v608_v37 = vadd.f32 %v607_v35, %v602_v34 }
 0x197   : > { %609 = vadd.xlane.f32.xlu1 %v608_v37 }
 0x199   : > { %605 = vadd.xlane.f32.xlu0 %v604_v38 }
 0x1a8   : > { %659 = vperm.xlu1 %788, %v655_v39  }
 0x1af   : > { %664 = vperm.xlu0 %787, %v656_v40  }
 0x220   : > { %v592_v43 = vpop.xlane.xlu1 %591 }
 0x221   : > { %v611_v45 = vmul.f32 0.00390625, %v592_v43 }
 0x222   : > { %v596_v44 = vpop.xlane.xlu0 %595 }
 0x223   : > { %v612_v46 = vmul.f32 0.00390625, %v596_v44  ;;  %v615_v52 = vmul.f32 %v611_v45, %v611_v45  ;;  %v621_v63 = vsub.f32 %v939_v9, %v611_v45  ;;  %v622_v0 = vsub.f32 %v941_v12, %v611_v45 }
 0x224   : > { %v610_v47 = vpop.xlane.xlu1 %609  ;;  %v623_v1 = vsub.f32 %v933_v5, %v611_v45 }
 0x225   : > { %v614_v48 = vmul.f32 0.00390625, %v610_v47  ;;  %v616_v49 = vmul.f32 %v612_v46, %v612_v46  ;;  %v624_v59 = vsub.f32 %v521_v17, %v612_v46  ;;  %v625_v60 = vsub.f32 %v523_v21, %v612_v46 }
 0x226   : > { %v606_v50 = vpop.xlane.xlu0 %605  ;;  %v626_v61 = vsub.f32 %v943_v14, %v612_v46 }
 0x227   : > { %v618_v51 = vsub.f32 %v614_v48, %v616_v49  ;;  %v613_v53 = vmul.f32 0.00390625, %v606_v50 }
 0x228   : > { %v660_v12 = vpop.permute.xlu1 %659 }
 0x229   : > { %v620_v54 = vmax.f32 %v618_v51, 0.0  ;;  %v617_v55 = vsub.f32 %v613_v53, %v615_v52 }
 0x22b   : > { %v628_v56 = vadd.f32 1e-05, %v620_v54  ;;  %v619_v57 = vmax.f32 %v617_v55, 0.0 }
 0x22d   : > { %796 = vrsqrt.f32 %v628_v56  ;;  %v627_v58 = vadd.f32 1e-05, %v619_v57 }
 0x22e   : > { %v665_v19 = vpop.permute.xlu0 %664 }
 0x22f   : > { %798 = vrsqrt.f32 %v627_v58 }
 0x237   : > { %v797_v62 = vpop.eup %796 }
 0x238   : > { %v634_v3 = vmul.f32 %v797_v62, %v624_v59  ;;  %v635_v4 = vmul.f32 %v797_v62, %v625_v60  ;;  %v636_v8 = vmul.f32 %v797_v62, %v626_v61 }
 0x239   : > { %v799_v10 = vpop.eup %798 }
 0x23a   : > { %v631_v11 = vmul.f32 %v799_v10, %v621_v63  ;;  %v632_v13 = vmul.f32 %v799_v10, %v622_v0  ;;  %v633_v15 = vmul.f32 %v799_v10, %v623_v1  ;;  %v652_v16 = vmul.f32 %v647_v41, %v634_v3 }
 0x23b   : > { %v653_v17 = vmul.f32 %v647_v41, %v635_v4  ;;  %v654_v18 = vmul.f32 %v647_v41, %v636_v8 }
 0x23c   : > { %v649_v14 = vmul.f32 %v642_v42, %v631_v11  ;;  %v650_v20 = vmul.f32 %v642_v42, %v632_v13  ;;  %v651_v21 = vmul.f32 %v642_v42, %v633_v15  ;;  %v670_v9 = vadd.f32 %v665_v19, %v652_v16 }
 0x23d   : > { %v671_v22 = vadd.f32 %v665_v19, %v653_v17  ;;  %v672_v5 = vadd.f32 %v665_v19, %v654_v18 }
 0x23e   : > { %v667_v23 = vadd.f32 %v660_v12, %v649_v14  ;;  %v668_v24 = vadd.f32 %v660_v12, %v650_v20  ;;  %v669_v25 = vadd.f32 %v660_v12, %v651_v21  ;;  %v676_v26 = vmul.f32 0.1, %v670_v9 }
 0x23f   : > { %v677_v27 = vmul.f32 0.1, %v671_v22  ;;  %v678_v28 = vmul.f32 0.1, %v672_v5 }
 0x240   : > { %v673_v29 = vmul.f32 0.1, %v667_v23  ;;  %v674_v30 = vmul.f32 0.1, %v668_v24  ;;  %v675_v31 = vmul.f32 0.1, %v669_v25  ;;  %v682_v32 = vmax.f32 %v670_v9, %v676_v26 }
 0x241   : > { %v683_v33 = vmax.f32 %v671_v22, %v677_v27  ;;  %v684_v34 = vmax.f32 %v672_v5, %v678_v28 }
 0x242   : > { %v679_v35 = vmax.f32 %v667_v23, %v673_v29  ;;  %v680_v36 = vmax.f32 %v668_v24, %v674_v30  ;;  %v681_v37 = vmax.f32 %v669_v25, %v675_v31  ;;  %v688_v38 = vmul.f32 %v682_v32, %v931_v2 }
 0x243   : > { %v689_v39 = vmul.f32 %v683_v33, %v937_v7  ;;  %v690_v40 = vmul.f32 %v684_v34, %v935_v6 }
 0x244   : > { %v685_v41 = vmul.f32 %v679_v35, %v931_v2  ;;  %v686_v42 = vmul.f32 %v680_v36, %v937_v7  ;;  %v687_v43 = vmul.f32 %v681_v37, %v935_v6  ;;  %694 = vst [vmem:[%s251_s10 + $0x18] sm:$0xff] %v688_v38 }
 0x245   : > { %695 = vst [vmem:[%s251_s10 + $0x20] sm:$0xff] %v689_v39  ;;  %696 = vst [vmem:[%s251_s10 + $0x28] sm:$0xff] %v690_v40 }
 0x246   : > { %691 = vst [vmem:[%s251_s10] sm:$0xff] %v685_v41  ;;  %692 = vst [vmem:[%s251_s10 + $0x8] sm:$0xff] %v686_v42 }
 0x247   : > { %693 = vst [vmem:[%s251_s10 + $0x10] sm:$0xff] %v687_v43 }
 0x248 PF: > { %s16_s21 = sadd.s32 1, %s806_s21  }
 0x249   : > { %p13_p4 = scmp.ge.s32.totalorder %s16_s21, 4  }
 0x24b   :  { %15 = sbr.rel (!%p13_p4) target bundleno = 1 (0x1), region = 74 }

// kernel: upcat_forward.4
= control target key start
LH: loop header
LB: loop body
LE: loop exit
PB: predicated region body
PF: predicated region fallthrough
CT: control target
= control target key end

     0   :  { %s1274_s24 = smov 0   ;;  %s1594_s0 = inlined_call_operand.vmem [shape: bf16[2,16,384], index: 0, kind: input, shape index: {}]   ;;  %s1595_s1 = inlined_call_operand.vmem [shape: bf16[2,16,384], index: 1, kind: input, shape index: {}]   ;;  %s1596_s2 = inlined_call_operand.vmem [shape: bf16[16,288], index: 2, kind: input, shape index: {}]   ;;  %s1597_s3 = inlined_call_operand.vmem [shape: f32[1,384], index: 3, kind: input, shape index: {}]   ;;  %s1598_s4 = inlined_call_operand.vmem [shape: f32[16,1], index: 4, kind: input, shape index: {}]   ;;  %s1599_s5 = inlined_call_operand.vmem [shape: f32[16,1], index: 5, kind: input, shape index: {}]   ;;  %s1600_s6 = inlined_call_operand.vmem [shape: f32[16,1], index: 6, kind: input, shape index: {}]   ;;  %s1601_s7 = inlined_call_operand.vmem [shape: bf16[2,16,384], index: 7, kind: output, shape index: {}]  }
   0x1 LB: > { %s1107_s25 = sadd.s32 4294967295, %s1221_s24   ;;  %p1111_p0 = scmp.ge.s32.totalorder %s1221_s24, 1  ;;  %s1221_s24 = sphi %s1274_s24, %s17_s24  }
   0x2   : > { %p247_p1 = scmp.lt.s32.totalorder %s1221_s24, 3 }
   0x4   : > { %p248_p2 = pnand %p1111_p0, %p247_p1 }
   0x5   : > { %p284_p3 = scmp.lt.s32.totalorder (!%p248_p2), %s1107_s25, 1  ;;  %s1223_s10 = smov (!%p248_p2), 19   ;;  %v1231_v6 = vmov (!%p248_p2), 0   ;;  %v1379_v7 = vld [vmem:[%s1596_s2 + $0x4] ss:$12 sps:$4 sm:$0xff] (!%p248_p2)   ;;  %v693_v8 = vld [vmem:[%s1598_s4 + $0x8] sm:$0xff] (!%p248_p2) }
   0x6   : > { %251 = sbr.rel (%p248_p2) target bundleno = 638 (0x27e), region = 48  ;;  %s1224_s11 = smov (!%p248_p2), 18   ;;  %798 = vmatprep.mubr.bf16.mxu1 (!%p248_p2), %v1231_v6  ;;  %1197 = vset.pattern.permute.xlu0 (!%p248_p2), %v1231_v6  ;;  %v692_v9 = vld [vmem:[%s1598_s4] sm:$0xff] (!%p248_p2)  ;;  %v963_v10 = vld [vmem:[%s1599_s5 + $0x8] sm:$0xff] (!%p248_p2)  ;;  %vm323_vm0 = vcmask (!%p248_p2), 154624   ;;  %vm342_vm1 = vcmask (!%p248_p2), 146432  }
   0x7   : > { %s1225_s12 = smov (!%p248_p2), 17   ;;  %s1226_s13 = smov (!%p248_p2), 1   ;;  %1198 = vset.pattern.permute.xlu1 (!%p248_p2), %v1231_v6  ;;  %755 = vmatprep.mubr.bf16.mxu0 (!%p248_p2), %v1379_v7  ;;  %v962_v11 = vld [vmem:[%s1599_s5] sm:$0xff] (!%p248_p2)  ;;  %vm361_vm2 = vcmask (!%p248_p2), 138240   ;;  %vm380_vm3 = vcmask (!%p248_p2), 7168   ;;  %vm405_vm4 = vcmask (!%p248_p2), 1039360  }
   0x8   : > { %s1227_s14 = smov (!%p248_p2), 127   ;;  %s1228_s15 = smov (!%p248_p2), 110   ;;  %vm443_vm5 = vcmask (!%p248_p2), 900096   ;;  %vm424_vm6 = vcmask (!%p248_p2), 908288   ;;  %vm462_vm7 = vcmask (!%p248_p2), 891904   ;;  %vm719_vm8 = vcmask (!%p248_p2), 261120  }
   0x9   : > { %s1229_s16 = smov (!%p248_p2), 111   ;;  %s1230_s17 = smov (!%p248_p2), 109   ;;  %v1472_v53 = vld [vmem:[%s1596_s2 + $0x8] ss:$12 sps:$4 sm:$0xff] (!%p248_p2)   ;;  %vm1233_vm9 = vmmov (!%p248_p2), 0  }
   0xd   : > { %s1603_s25 = smov (!%p284_p3, %s1107_s25), 1 }
   0xe   : > { %s1282_s26 = smul.u32 24, %s1603_s25 }
  0x10   : > { %s288_s29 = scalar_lea.vmem %s1594_s0, %s1282_s26  ;;  %s293_s9 = scalar_lea.vmem %s1595_s1, %s1282_s26 }
  0x11   : > { %v1288_v0 = vld [vmem:[%s288_s29 + $0x8] ss:$12 sps:$4 sm:$0xff]   ;;  %v1290_v1 = vld [vmem:[%s288_s29] ss:$12 sps:$4 sm:$0xff]   ;;  %v1300_v2 = vld [vmem:[%s288_s29 + $0x4] ss:$12 sps:$4 sm:$0xff]   ;;  %s298_s19 = scalar_lea.vmem %s1601_s7, %s1282_s26 }
  0x12   : > { %309 = vrot.lane.b32.xlu1 %v1288_v0, %s1223_s10  ;;  %319 = vrot.lane.b32.xlu0 %v1290_v1, %s1223_s10  ;;  %v1324_v3 = vld [vmem:[%s293_s9 + $0x4] ss:$12 sps:$4 sm:$0xff]   ;;  %v1329_v4 = vld [vmem:[%s293_s9] ss:$12 sps:$4 sm:$0xff]  }
  0x13   : > { %v1333_v5 = vld [vmem:[%s293_s9 + $0x8] ss:$12 sps:$4 sm:$0xff]  }
  0x16   : > { %338 = vrot.lane.b32.xlu1 %v1290_v1, %s1224_s11  ;;  %321 = vrot.lane.b32.xlu0 %v1300_v2, %s1223_s10 }
  0x1a   : > { %336 = vrot.lane.b32.xlu1 %v1288_v0, %s1224_s11  ;;  %340 = vrot.lane.b32.xlu0 %v1300_v2, %s1224_s11 }
  0x1e   : > { %359 = vrot.lane.b32.xlu1 %v1300_v2, %s1225_s12  ;;  %357 = vrot.lane.b32.xlu0 %v1290_v1, %s1225_s12 }
  0x22   : > { %376 = vrot.lane.b32.xlu1 %v1290_v1, %s1226_s13  ;;  %355 = vrot.lane.b32.xlu0 %v1288_v0, %s1225_s12 }
  0x26   : > { %374 = vrot.lane.b32.xlu1 %v1288_v0, %s1226_s13  ;;  %378 = vrot.lane.b32.xlu0 %v1300_v2, %s1226_s13 }
  0x2a   : > { %403 = vrot.lane.b32.xlu1 %v1288_v0, %s1227_s14  ;;  %401 = vrot.lane.b32.xlu0 %v1300_v2, %s1227_s14 }
  0x2e   : > { %602 = vrot.lane.b32.xlu1 %v1324_v3, %s1228_s15  ;;  %399 = vrot.lane.b32.xlu0 %v1290_v1, %s1227_s14 }
  0x32   : > { %600 = vrot.lane.b32.xlu1 %v1329_v4, %s1228_s15  ;;  %604 = vrot.lane.b32.xlu0 %v1333_v5, %s1228_s15 }
  0x36   : > { %422 = vrot.lane.b32.xlu1 %v1288_v0, %s1229_s16  ;;  %420 = vrot.lane.b32.xlu0 %v1300_v2, %s1229_s16 }
  0x3a   : > { %619 = vrot.lane.b32.xlu1 %v1324_v3, %s1230_s17  ;;  %418 = vrot.lane.b32.xlu0 %v1290_v1, %s1229_s16 }
  0x3e   : > { %617 = vrot.lane.b32.xlu1 %v1329_v4, %s1230_s17  ;;  %621 = vrot.lane.b32.xlu0 %v1333_v5, %s1230_s17 }
  0x42   : > { %441 = vrot.lane.b32.xlu1 %v1288_v0, %s1228_s15  ;;  %439 = vrot.lane.b32.xlu0 %v1300_v2, %s1228_s15 }
  0x46   : > { %456 = vrot.lane.b32.xlu1 %v1290_v1, %s1230_s17  ;;  %437 = vrot.lane.b32.xlu0 %v1290_v1, %s1228_s15 }
  0x4a   : > { %458 = vrot.lane.b32.xlu1 %v1300_v2, %s1230_s17  ;;  %460 = vrot.lane.b32.xlu0 %v1288_v0, %s1230_s17 }
  0x4e   : > { %496 = vrot.lane.b32.xlu1 %v1324_v3, %s1223_s10  ;;  %484 = vrot.lane.b32.xlu0 %v1333_v5, %s1223_s10 }
  0x52   : > { %509 = vrot.lane.b32.xlu1 %v1333_v5, %s1224_s11  ;;  %494 = vrot.lane.b32.xlu0 %v1329_v4, %s1223_s10 }
  0x56   : > { %511 = vrot.lane.b32.xlu1 %v1329_v4, %s1224_s11  ;;  %513 = vrot.lane.b32.xlu0 %v1324_v3, %s1224_s11 }
  0x5a   : > { %530 = vrot.lane.b32.xlu1 %v1324_v3, %s1225_s12  ;;  %526 = vrot.lane.b32.xlu0 %v1333_v5, %s1225_s12 }
  0x5e   : > { %543 = vrot.lane.b32.xlu1 %v1333_v5, %s1226_s13  ;;  %528 = vrot.lane.b32.xlu0 %v1329_v4, %s1225_s12 }
  0x62   : > { %545 = vrot.lane.b32.xlu1 %v1329_v4, %s1226_s13  ;;  %547 = vrot.lane.b32.xlu0 %v1324_v3, %s1226_s13 }
  0x66   : > { %570 = vrot.lane.b32.xlu1 %v1333_v5, %s1227_s14  ;;  %566 = vrot.lane.b32.xlu0 %v1329_v4, %s1227_s14 }
  0x6a   : > { %583 = vrot.lane.b32.xlu1 %v1329_v4, %s1229_s16  ;;  %568 = vrot.lane.b32.xlu0 %v1324_v3, %s1227_s14 }
  0x6e   : > { %585 = vrot.lane.b32.xlu1 %v1324_v3, %s1229_s16  ;;  %587 = vrot.lane.b32.xlu0 %v1333_v5, %s1229_s16 }
  0x72   : > { %701 = vperm.xlu1 %1198, %v693_v8   ;;  %696 = vperm.xlu0 %1197, %v692_v9  }
  0x76   : > { %971 = vperm.xlu1 %1198, %v963_v10   ;;  %966 = vperm.xlu0 %1197, %v962_v11  }
  0x84   : > { %v1406_v12 = vpop.permute.xlu1 %309  ;;  %v320_v13 = vpop.permute.xlu0 %319 }
  0x85   : > { %v331_v17 = vsel %vm323_vm0, %v1406_v12, %v320_v13 }
  0x88   : > { %v339_v14 = vpop.permute.xlu1 %338  ;;  %v1408_v15 = vpop.permute.xlu0 %321 }
  0x89   : > { %v324_v16 = vsel %vm323_vm0, %v320_v13, %v1408_v15 }
  0x8a   : > { %723 = vmatprep.subr.bf16.mxu0 %v324_v16 }
  0x8b   : > { %724 = vmatpush1.bf16.msra.mxu0 %v331_v17 }
  0x8c   : > { %v1414_v18 = vpop.permute.xlu1 %336  ;;  %v1416_v19 = vpop.permute.xlu0 %340 }
  0x8d   : > { %v350_v20 = vsel %vm342_vm1, %v1414_v18, %v339_v14  ;;  %v343_v21 = vsel %vm342_vm1, %v339_v14, %v1416_v19  ;;  %v344_v9 = vsel %vm342_vm1, %v1416_v19, %v1414_v18 }
  0x8e   : > { %725 = vmatprep.subr.bf16.mxu0 %v343_v21 }
  0x8f   : > { %726 = vmatpush1.bf16.msra.mxu0 %v350_v20 }
  0x90   : > { %v1422_v22 = vpop.permute.xlu1 %359  ;;  %v358_v23 = vpop.permute.xlu0 %357 }
  0x91   : > { %v362_v24 = vsel %vm361_vm2, %v358_v23, %v1422_v22 }
  0x92   : > { %727 = vmatprep.subr.bf16.mxu0 %v362_v24 }
  0x94   : > { %v377_v25 = vpop.permute.xlu1 %376  ;;  %v1426_v26 = vpop.permute.xlu0 %355 }
  0x95   : > { %v369_v27 = vsel %vm361_vm2, %v1426_v26, %v358_v23  ;;  %v363_v18 = vsel %vm361_vm2, %v1422_v22, %v1426_v26 }
  0x96   : > { %728 = vmatpush1.bf16.msra.mxu0 %v369_v27 }
  0x98   : > { %v1430_v28 = vpop.permute.xlu1 %374  ;;  %v1432_v29 = vpop.permute.xlu0 %378 }
  0x99   : > { %v388_v30 = vsel %vm380_vm3, %v1430_v28, %v377_v25  ;;  %v381_v31 = vsel %vm380_vm3, %v377_v25, %v1432_v29  ;;  %v382_v24 = vsel %vm380_vm3, %v1432_v29, %v1430_v28 }
  0x9a   : > { %729 = vmatprep.subr.bf16.mxu0 %v381_v31 }
  0x9b   : > { %730 = vmatpush1.bf16.msra.mxu0 %v388_v30 }
  0x9c   : > { %v1438_v32 = vpop.permute.xlu1 %403  ;;  %v402_v33 = vpop.permute.xlu0 %401  ;;  %731 = vmatprep.subr.bf16.mxu0 %v1300_v2  ;;  %v325_v2 = vsel %vm323_vm0, %v1408_v15, %v1406_v12 }
  0x9d   : > { %v407_v35 = vsel %vm405_vm4, %v402_v33, %v1438_v32 }
  0x9f   : > { %732 = vmatpush1.bf16.msra.mxu0 %v1290_v1 }
  0xa0   : > { %v603_v34 = vpop.permute.xlu1 %602  ;;  %733 = vmatprep.subr.bf16.mxu0 %v407_v35  ;;  %v1444_v36 = vpop.permute.xlu0 %399 }
  0xa1   : > { %v406_v37 = vsel %vm405_vm4, %v1444_v36, %v402_v33 }
  0xa3   : > { %734 = vmatpush1.bf16.msra.mxu0 %v406_v37  ;;  %v413_v37 = vsel %vm405_vm4, %v1438_v32, %v1444_v36 }
  0xa4   : > { %v601_v38 = vpop.permute.xlu1 %600  ;;  %v605_v39 = vpop.permute.xlu0 %604 }
  0xa5   : > { %v606_v40 = vsel %vm443_vm5, %v601_v38, %v603_v34  ;;  %v1450_v41 = vsel %vm443_vm5, %v605_v39, %v601_v38  ;;  %v607_v42 = vsel %vm443_vm5, %v603_v34, %v605_v39 }
  0xa6   : > { %766 = vmatprep.subr.bf16.mxu1 %v607_v42 }
  0xa7   : > { %767 = vmatpush1.bf16.msra.mxu1 %v606_v40 }
  0xa8   : > { %v1453_v43 = vpop.permute.xlu1 %422  ;;  %v421_v44 = vpop.permute.xlu0 %420 }
  0xa9   : > { %v426_v45 = vsel %vm424_vm6, %v421_v44, %v1453_v43 }
  0xaa   : > { %735 = vmatprep.subr.bf16.mxu0 %v426_v45 }
  0xac   : > { %v620_v46 = vpop.permute.xlu1 %619  ;;  %v1457_v47 = vpop.permute.xlu0 %418 }
  0xad   : > { %v425_v48 = vsel %vm424_vm6, %v1457_v47, %v421_v44 }
  0xae   : > { %736 = vmatpush1.bf16.msra.mxu0 %v425_v48 }
  0xb0   : > { %v1461_v49 = vpop.permute.xlu1 %617  ;;  %v1463_v50 = vpop.permute.xlu0 %621 }
  0xb1   : > { %v623_v51 = vsel %vm462_vm7, %v1461_v49, %v620_v46  ;;  %v624_v52 = vsel %vm462_vm7, %v620_v46, %v1463_v50  ;;  %v1232_v46 = vmov 0.0  }
  0xb2   : > { %768 = vmatprep.subr.bf16.mxu1 %v624_v52 }
  0xb3   : > { %769 = vmatpush1.bf16.msra.mxu1 %v623_v51 }
  0xb4   : > { %v1474_v54 = vpop.permute.xlu1 %441  ;;  %v440_v55 = vpop.permute.xlu0 %439 }
  0xb5   : > { %v445_v56 = vsel %vm443_vm5, %v440_v55, %v1474_v54 }
  0xb6   : > { %737 = vmatprep.subr.bf16.mxu0 %v445_v56  ;;  %1124 = vmatmul.mubr.msk.bf16.vlgmr.msra.gmra.mrb[0].mxu1 %vm719_vm8, %v1472_v53 }
  0xb7   : > { %841 = vmatprep.mubr.bf16.mxu1 %v1379_v7 }
  0xb8   : > { %v457_v57 = vpop.permute.xlu1 %456  ;;  %v1481_v58 = vpop.permute.xlu0 %437 }
  0xb9   : > { %v444_v59 = vsel %vm443_vm5, %v1481_v58, %v440_v55  ;;  %v451_v45 = vsel %vm443_vm5, %v1474_v54, %v1481_v58  ;;  %v893_v55 = vlaneseq }
  0xba   : > { %738 = vmatpush1.bf16.msra.mxu0 %v444_v59  ;;  %v891_v59 = vld [vmem:[%s1597_s3] sm:$0x7] }
  0xbb   : > { %v894_v56 = vshrl.u32 %v893_v55, 7 }
  0xbc   : > { %v459_v60 = vpop.permute.xlu1 %458  ;;  %v461_v61 = vpop.permute.xlu0 %460 }
  0xbd   : > { %v463_v62 = vsel %vm462_vm7, %v457_v57, %v459_v60  ;;  %v464_v63 = vsel %vm462_vm7, %v459_v60, %v461_v61  ;;  %v470_v1 = vsel %vm462_vm7, %v461_v61, %v457_v57  ;;  %v899_v58 = vsub.s32 1, %v894_v56 }
  0xbe   : > { %739 = vmatprep.subr.bf16.mxu0 %v464_v63  ;;  %1136 = vmatprep.subr.bf16.mxu1 %v470_v1 }
  0xbf   : > { %740 = vmatpush1.bf16.msra.mxu0 %v463_v62  ;;  %1137 = vmatpush3.bf16.msra.mxu1 %v325_v2  ;;  %v1543_v1 = vrot.slane %v891_v59, %v899_v58 }
  0xc0   : > { %v497_v6 = vpop.permute.xlu1 %496  ;;  %v485_v7 = vpop.permute.xlu0 %484 }
  0xc1   : > { %v499_v8 = vsel %vm323_vm0, %v497_v6, %v485_v7 }
  0xc2   : > { %1138 = vmatprep.subr.bf16.mxu1 %v499_v8 }
  0xc3   : > { %1139 = vmatpush3.bf16.msra.mxu1 %v344_v9 }
  0xc4   : > { %v510_v10 = vpop.permute.xlu1 %509  ;;  %v495_v11 = vpop.permute.xlu0 %494 }
  0xc5   : > { %v498_v13 = vsel %vm323_vm0, %v495_v11, %v497_v6  ;;  %v504_v12 = vsel %vm323_vm0, %v485_v7, %v495_v11 }
  0xc6   : > { %741 = vmatprep.subr.bf16.mxu0 %v498_v13 }
  0xc7   : > { %742 = vmatpush1.bf16.msra.mxu0 %v504_v12  ;;  %v903_v12 = vsub.s32 2, %v894_v56 }
  0xc8   : > { %v512_v14 = vpop.permute.xlu1 %511  ;;  %v514_v15 = vpop.permute.xlu0 %513 }
  0xc9   : > { %v521_v16 = vsel %vm342_vm1, %v510_v10, %v512_v14  ;;  %v515_v17 = vsel %vm342_vm1, %v512_v14, %v514_v15  ;;  %v516_v20 = vsel %vm342_vm1, %v514_v15, %v510_v10 }
  0xca   : > { %743 = vmatprep.subr.bf16.mxu0 %v515_v17  ;;  %1140 = vmatprep.subr.bf16.mxu1 %v516_v20 }
  0xcb   : > { %744 = vmatpush1.bf16.msra.mxu0 %v521_v16  ;;  %1141 = vmatpush3.bf16.msra.mxu1 %v363_v18 }
  0xcc   : > { %v531_v19 = vpop.permute.xlu1 %530  ;;  %v527_v21 = vpop.permute.xlu0 %526 }
  0xcd   : > { %v533_v23 = vsel %vm361_vm2, %v531_v19, %v527_v21 }
  0xce   : > { %1142 = vmatprep.subr.bf16.mxu1 %v533_v23 }
  0xcf   : > { %1143 = vmatpush3.bf16.msra.mxu1 %v382_v24  ;;  %v1561_v24 = vrot.slane %v891_v59, %v903_v12 }
  0xd0   : > { %v544_v25 = vpop.permute.xlu1 %543  ;;  %v529_v27 = vpop.permute.xlu0 %528 }
  0xd1   : > { %v532_v30 = vsel %vm361_vm2, %v529_v27, %v531_v19  ;;  %v538_v22 = vsel %vm361_vm2, %v527_v21, %v529_v27 }
  0xd2   : > { %745 = vmatprep.subr.bf16.mxu0 %v532_v30 }
  0xd3   : > { %746 = vmatpush1.bf16.msra.mxu0 %v538_v22 }
  0xd4   : > { %v546_v26 = vpop.permute.xlu1 %545  ;;  %v548_v31 = vpop.permute.xlu0 %547 }
  0xd5   : > { %v555_v33 = vsel %vm380_vm3, %v544_v25, %v546_v26  ;;  %v549_v34 = vsel %vm380_vm3, %v546_v26, %v548_v31  ;;  %v550_v35 = vsel %vm380_vm3, %v548_v31, %v544_v25 }
  0xd6   : > { %747 = vmatprep.subr.bf16.mxu0 %v549_v34  ;;  %1144 = vmatprep.subr.bf16.mxu1 %v550_v35 }
  0xd7   : > { %748 = vmatpush1.bf16.msra.mxu0 %v555_v33  ;;  %1145 = vmatpush3.bf16.msra.mxu1 %v1288_v0 }
  0xd8   : > { %v571_v28 = vpop.permute.xlu1 %570  ;;  %v567_v29 = vpop.permute.xlu0 %566  ;;  %749 = vmatprep.subr.bf16.mxu0 %v1324_v3  ;;  %1146 = vmatprep.subr.bf16.mxu1 %v1333_v5  ;;  %v432_v3 = vsel %vm424_vm6, %v1453_v43, %v1457_v47  ;;  %v1208_v43 = vld [vmem:[%s1596_s2] ss:$12 sps:$4 sm:$0xff]   ;;  %v629_v47 = vsel %vm462_vm7, %v1463_v50, %v1461_v49 }
  0xd9   : > { %v578_v39 = vsel %vm405_vm4, %v571_v28, %v567_v29 }
  0xdb   : > { %750 = vmatpush1.bf16.msra.mxu0 %v1329_v4  ;;  %1147 = vmatpush3.bf16.msra.mxu1 %v413_v37 }
  0xdc   : > { %v584_v38 = vpop.permute.xlu1 %583  ;;  %1148 = vmatprep.subr.bf16.mxu1 %v578_v39  ;;  %v569_v40 = vpop.permute.xlu0 %568 }
  0xdd   : > { %v573_v0 = vsel %vm405_vm4, %v569_v40, %v571_v28  ;;  %v572_v42 = vsel %vm405_vm4, %v567_v29, %v569_v40 }
  0xde   : > { %751 = vmatprep.subr.bf16.mxu0 %v573_v0 }
  0xdf   : > { %752 = vmatpush1.bf16.msra.mxu0 %v572_v42  ;;  %1149 = vmatpush3.bf16.msra.mxu1 %v432_v3 }
  0xe0   : > { %v586_v5 = vpop.permute.xlu1 %585  ;;  %v588_v32 = vpop.permute.xlu0 %587 }
  0xe1   : > { %v589_v4 = vsel %vm424_vm6, %v584_v38, %v586_v5  ;;  %v590_v36 = vsel %vm424_vm6, %v586_v5, %v588_v32  ;;  %v595_v44 = vsel %vm424_vm6, %v588_v32, %v584_v38 }
  0xe2   : > { %753 = vmatprep.subr.bf16.mxu0 %v590_v36  ;;  %1150 = vmatprep.subr.bf16.mxu1 %v595_v44 }
  0xe3   : > { %754 = vmatpush1.bf16.msra.mxu0 %v589_v4  ;;  %1151 = vmatpush3.bf16.msra.mxu1 %v451_v45 }
  0xe4   : > { %1161 = vmatprep.subr.bf16.mxu1 %v1232_v46 }
  0xe6   : > { %756 = vmatmul.mubr.bf16.vlgmr.msra.gmra.mrb[0].mxu0 %v1208_v43  ;;  %842 = vmatmul.mubr.bf16.vlgmr.msra.gmra.mrb[4].mxu1 %v1208_v43  ;;  %v980_v43 = vld [vmem:[%s1600_s6] sm:$0xff] }
  0xe7   : > { %1162 = vmatpush3.bf16.msra.mxu1 %v1450_v41  ;;  %1165 = vmatprep.mubr.msk.bf16.mxu1 %vm1233_vm9, %v1232_v46  ;;  %v895_v41 = vsub.s32 0, %v894_v56 }
  0xe8   : > { %1163 = vmatprep.subr.bf16.mxu1 %v1232_v46  ;;  %v981_v46 = vld [vmem:[%s1600_s6 + $0x8] sm:$0xff] }
  0xe9   : > { %v1545_v7 = vrot.slane %v891_v59, %v895_v41 }
  0xeb   : > { %1164 = vmatpush3.bf16.msra.mxu1 %v629_v47 }
  0xee   : > { %1166 = vmatmul.mubr.msk.bf16.vlgmr.msra.gmra.mrb[8].mxu1 %vm719_vm8, %v1472_v53 }
  0xf1   : > { %v697_v57 = vpop.permute.xlu0 %696  ;;  %v702_v60 = vpop.permute.xlu1 %701 }
  0xf5   : > { %v972_v47 = vpop.permute.xlu1 %971 }
 0x189   : > { %v800_v48 = vpop.f32.mrb[0].mxu1 }
 0x18a   : > { %v802_v51 = vpop.f32.mrb[1].mxu1 }
 0x18b   : > { %v804_v52 = vpop.f32.mrb[2].mxu1 }
 0x18c   : > { %v806_v54 = vpop.f32.mrb[3].mxu1 }
 0x1b9   : > { %v757_v61 = vpop.f32.mrb[0].mxu0  ;;  %v1152_v49 = vpop.f32.mrb[4].mxu1 }
 0x1ba   : > { %v758_v50 = vadd.f32 %v757_v61, %v697_v57  ;;  %v759_v62 = vpop.f32.mrb[1].mxu0  ;;  %v1153_v63 = vpop.f32.mrb[5].mxu1 }
 0x1bb   : > { %v760_v53 = vadd.f32 %v759_v62, %v697_v57  ;;  %v1154_v2 = vadd.f32 %v1153_v63, %v1152_v49  ;;  %v761_v6 = vpop.f32.mrb[2].mxu0  ;;  %v1155_v8 = vpop.f32.mrb[6].mxu1 }
 0x1bc   : > { %v1547_v9 = vadd.f32 %v800_v48, %v758_v50  ;;  %v762_v10 = vadd.f32 %v761_v6, %v702_v60  ;;  %v763_v11 = vpop.f32.mrb[3].mxu0  ;;  %v1156_v13 = vpop.f32.mrb[7].mxu1 }
 0x1bd   : > { %v1549_v14 = vadd.f32 %v802_v51, %v760_v53  ;;  %v764_v15 = vadd.f32 %v763_v11, %v702_v60  ;;  %v1157_v16 = vadd.f32 %v1156_v13, %v1155_v8  ;;  %v844_v23 = vadd.f32 %v1154_v2, %v697_v57  ;;  %v967_v48 = vpop.permute.xlu0 %966 }
 0x1be   : > { %v1551_v17 = vadd.f32 %v804_v52, %v762_v10  ;;  %v908_v19 = vmul.f32 %v1545_v7, %v1547_v9 }
 0x1bf   : > { %v909_v20 = vmul.f32 %v1543_v1, %v1549_v14  ;;  %v1555_v18 = vadd.f32 %v806_v54, %v764_v15  ;;  %v847_v26 = vadd.f32 %v1157_v16, %v702_v60 }
 0x1c0   : > { %v911_v21 = vmul.f32 %v1545_v7, %v1551_v17  ;;  %v922_v38 = vmul.f32 %v908_v19, %v908_v19 }
 0x1c1   : > { %v912_v25 = vmul.f32 %v1543_v1, %v1555_v18  ;;  %v884_v27 = vpop.f32.mrb[8].mxu1  ;;  %v914_v33 = vadd.f32 %v909_v20, %v908_v19  ;;  %v923_v42 = vmul.f32 %v909_v20, %v909_v20 }
 0x1c2   : > { %v1565_v30 = vadd.f32 %v884_v27, %v844_v23  ;;  %v1167_v22 = vpop.f32.mrb[9].mxu1  ;;  %v925_v29 = vmul.f32 %v911_v21, %v911_v21 }
 0x1c3   : > { %v887_v31 = vpop.f32.mrb[10].mxu1  ;;  %v926_v37 = vmul.f32 %v912_v25, %v912_v25  ;;  %v918_v0 = vadd.f32 %v912_v25, %v911_v21  ;;  %v928_v44 = vadd.f32 %v923_v42, %v922_v38 }
 0x1c4   : > { %v910_v34 = vmul.f32 %v1561_v24, %v1565_v30  ;;  %v888_v35 = vadd.f32 %v887_v31, %v847_v26  ;;  %v1168_v28 = vpop.f32.mrb[11].mxu1 }
 0x1c5   : > { %v932_v32 = vadd.f32 %v926_v37, %v925_v29 }
 0x1c6   : > { %v913_v39 = vmul.f32 %v1561_v24, %v888_v35  ;;  %v915_v40 = vadd.f32 %v914_v33, %v910_v34  ;;  %v924_v4 = vmul.f32 %v910_v34, %v910_v34 }
 0x1c8   : > { %916 = vadd.xlane.f32.xlu1 %v915_v40  ;;  %v919_v3 = vadd.f32 %v918_v0, %v913_v39  ;;  %v927_v5 = vmul.f32 %v913_v39, %v913_v39  ;;  %v929_v45 = vadd.f32 %v928_v44, %v924_v4 }
 0x1ca   : > { %920 = vadd.xlane.f32.xlu0 %v919_v3  ;;  %v933_v36 = vadd.f32 %v932_v32, %v927_v5 }
 0x1cc   : > { %934 = vadd.xlane.f32.xlu1 %v933_v36 }
 0x1ce   : > { %930 = vadd.xlane.f32.xlu0 %v929_v45 }
 0x1dd   : > { %984 = vperm.xlu1 %1198, %v980_v43  }
 0x1e4   : > { %989 = vperm.xlu0 %1197, %v981_v46  }
 0x255   : > { %v917_v51 = vpop.xlane.xlu1 %916 }
 0x256   : > { %v936_v54 = vmul.f32 0.00390625, %v917_v51 }
 0x257   : > { %v921_v52 = vpop.xlane.xlu0 %920 }
 0x258   : > { %v937_v55 = vmul.f32 0.00390625, %v921_v52  ;;  %v940_v60 = vmul.f32 %v936_v54, %v936_v54  ;;  %v946_v11 = vsub.f32 %v1547_v9, %v936_v54  ;;  %v947_v13 = vsub.f32 %v1549_v14, %v936_v54 }
 0x259   : > { %v935_v56 = vpop.xlane.xlu1 %934  ;;  %v948_v12 = vsub.f32 %v1565_v30, %v936_v54 }
 0x25a   : > { %v939_v57 = vmul.f32 0.00390625, %v935_v56  ;;  %v941_v58 = vmul.f32 %v937_v55, %v937_v55  ;;  %v949_v2 = vsub.f32 %v1551_v17, %v937_v55  ;;  %v950_v6 = vsub.f32 %v1555_v18, %v937_v55 }
 0x25b   : > { %v931_v41 = vpop.xlane.xlu0 %930  ;;  %v951_v8 = vsub.f32 %v888_v35, %v937_v55 }
 0x25c   : > { %v943_v59 = vsub.f32 %v939_v57, %v941_v58  ;;  %v938_v61 = vmul.f32 0.00390625, %v931_v41 }
 0x25d   : > { %v985_v9 = vpop.permute.xlu1 %984 }
 0x25e   : > { %v945_v49 = vmax.f32 %v943_v59, 0.0  ;;  %v942_v50 = vsub.f32 %v938_v61, %v940_v60 }
 0x260   : > { %v953_v62 = vadd.f32 1e-05, %v945_v49  ;;  %v944_v63 = vmax.f32 %v942_v50, 0.0 }
 0x262   : > { %1211 = vrsqrt.f32 %v953_v62  ;;  %v952_v53 = vadd.f32 1e-05, %v944_v63 }
 0x263   : > { %v990_v26 = vpop.permute.xlu0 %989 }
 0x264   : > { %1213 = vrsqrt.f32 %v952_v53 }
 0x26c   : > { %v1212_v10 = vpop.eup %1211 }
 0x26d   : > { %v959_v15 = vmul.f32 %v1212_v10, %v949_v2  ;;  %v960_v16 = vmul.f32 %v1212_v10, %v950_v6  ;;  %v961_v20 = vmul.f32 %v1212_v10, %v951_v8 }
 0x26e   : > { %v1214_v19 = vpop.eup %1213 }
 0x26f   : > { %v956_v21 = vmul.f32 %v1214_v19, %v946_v11  ;;  %v957_v23 = vmul.f32 %v1214_v19, %v947_v13  ;;  %v958_v25 = vmul.f32 %v1214_v19, %v948_v12  ;;  %v977_v27 = vmul.f32 %v972_v47, %v959_v15 }
 0x270   : > { %v978_v22 = vmul.f32 %v972_v47, %v960_v16  ;;  %v979_v17 = vmul.f32 %v972_v47, %v961_v20 }
 0x271   : > { %v974_v18 = vmul.f32 %v967_v48, %v956_v21  ;;  %v975_v31 = vmul.f32 %v967_v48, %v957_v23  ;;  %v976_v33 = vmul.f32 %v967_v48, %v958_v25  ;;  %v995_v34 = vadd.f32 %v990_v26, %v977_v27 }
 0x272   : > { %v996_v35 = vadd.f32 %v990_v26, %v978_v22  ;;  %v997_v14 = vadd.f32 %v990_v26, %v979_v17 }
 0x273   : > { %v992_v28 = vadd.f32 %v985_v9, %v974_v18  ;;  %v993_v30 = vadd.f32 %v985_v9, %v975_v31  ;;  %v994_v29 = vadd.f32 %v985_v9, %v976_v33  ;;  %v1001_v37 = vmul.f32 0.1, %v995_v34 }
 0x274   : > { %v1002_v38 = vmul.f32 0.1, %v996_v35  ;;  %v1003_v39 = vmul.f32 0.1, %v997_v14 }
 0x275   : > { %v998_v40 = vmul.f32 0.1, %v992_v28  ;;  %v999_v0 = vmul.f32 0.1, %v993_v30  ;;  %v1000_v42 = vmul.f32 0.1, %v994_v29  ;;  %v1007_v3 = vmax.f32 %v995_v34, %v1001_v37 }
 0x276   : > { %v1008_v5 = vmax.f32 %v996_v35, %v1002_v38  ;;  %v1009_v32 = vmax.f32 %v997_v14, %v1003_v39 }
 0x277   : > { %v1004_v4 = vmax.f32 %v992_v28, %v998_v40  ;;  %v1005_v36 = vmax.f32 %v993_v30, %v999_v0  ;;  %v1006_v44 = vmax.f32 %v994_v29, %v1000_v42  ;;  %v1013_v45 = vmul.f32 %v1007_v3, %v1545_v7 }
 0x278   : > { %v1014_v43 = vmul.f32 %v1008_v5, %v1543_v1  ;;  %v1015_v46 = vmul.f32 %v1009_v32, %v1561_v24 }
 0x279   : > { %v1010_v47 = vmul.f32 %v1004_v4, %v1545_v7  ;;  %v1011_v48 = vmul.f32 %v1005_v36, %v1543_v1  ;;  %v1012_v51 = vmul.f32 %v1006_v44, %v1561_v24 }
 0x27a   : > { %v1134_v52 = vpack.c.bf16 %v1014_v43, %v1013_v45  ;;  %v1135_v54 = vpack.c.bf16 %v1015_v46, %v1015_v46 }
 0x27b   : > { %v1132_v55 = vpack.c.bf16 %v1011_v48, %v1010_v47  ;;  %v1133_v56 = vpack.c.bf16 %v1012_v51, %v1012_v51 }
 0x27c   : > { %1038 = vst [vmem:[%s298_s19 + $0xc] sm:$0xff] %v1134_v52  ;;  %1039 = vst [vmem:[%s298_s19 + $0x14] sm:$0xf] %v1135_v54 }
 0x27d   : > { %1036 = vst [vmem:[%s298_s19] sm:$0xff] %v1132_v55  ;;  %1037 = vst [vmem:[%s298_s19 + $0x8] sm:$0xf] %v1133_v56 }
 0x27e PF: > { %s17_s24 = sadd.s32 1, %s1221_s24  }
 0x27f   : > { %p14_p4 = scmp.ge.s32.totalorder %s17_s24, 4  }
 0x281   :  { %16 = sbr.rel (!%p14_p4) target bundleno = 1 (0x1), region = 81 }

</bundles_post_ra>
